<compile_context>
chip_gen: v7x
topology: tpu7x:2x2x1
jax: 0.10.0
libtpu: 0.0.40
codegen_flags: <defaults>
</compile_context>

<pallas_src>
import functools
import math

import jax
import jax.numpy as jnp
from jax.experimental import pallas as pl
from jax.experimental.pallas import tpu as pltpu

LN_EPS = 1e-5  # torch.nn.LayerNorm default


def _layer_norm(x, gamma, beta):
    mu = jnp.mean(x, axis=-1, keepdims=True)
    var = jnp.mean((x - mu) ** 2, axis=-1, keepdims=True)
    return (x - mu) * jax.lax.rsqrt(var + LN_EPS) * gamma + beta


# ----------------------------------------------------------------------------
# Kernel: one (batch-block, layer) grid step = one full EncoderLayer applied
# to Bb sequences.  The output block is resident across the layer axis and
# doubles as the cross-layer activation carry.
# ----------------------------------------------------------------------------
def encoder_stack_kernel(*refs, n_heads, has_bias):
    if has_bias:
        (x_ref, bias_ref,
         wqkv_ref, bqkv_ref, wo_ref, bo_ref,
         g1_ref, bt1_ref, w1_ref, b1_ref, w2_ref, b2_ref,
         g2_ref, bt2_ref, ng_ref, nb_ref, o_ref) = refs
    else:
        (x_ref,
         wqkv_ref, bqkv_ref, wo_ref, bo_ref,
         g1_ref, bt1_ref, w1_ref, b1_ref, w2_ref, b2_ref,
         g2_ref, bt2_ref, ng_ref, nb_ref, o_ref) = refs
        bias_ref = None

    l = pl.program_id(1)
    n_layers = pl.num_programs(1)

    # Seed the resident carry (output block) from the input on the first layer.
    @pl.when(l == 0)
    def _():
        o_ref[...] = x_ref[...].astype(o_ref.dtype)

    xb = o_ref[...].astype(jnp.float32)               # (Bb, S, D)
    Bb, S, D = xb.shape
    H = n_heads
    dk = D // H
    inv_sqrt_dk = 1.0 / math.sqrt(dk)

    # Flatten the batch block into the MXU M dimension for all projections.
    x2d = xb.reshape(Bb * S, D)
    x_bf = x2d.astype(jnp.bfloat16)

    # --- fused QKV projection (bf16 operands, f32 accumulation) --------------
    qkv = jnp.dot(x_bf, wqkv_ref[0],
                  preferred_element_type=jnp.float32) + bqkv_ref[0]   # (Bb*S, 3D)
    q = qkv[:, :D] * inv_sqrt_dk                       # fold 1/sqrt(dk) into Q once
    k = qkv[:, D:2 * D]
    v = qkv[:, 2 * D:]

    # Heads batched on a single leading axis: (Bb*H, S, dk)
    def to_heads(t):
        t = t.reshape(Bb, S, H, dk)
        t = jnp.transpose(t, (0, 2, 1, 3))
        return t.reshape(Bb * H, S, dk).astype(jnp.bfloat16)

    q3 = to_heads(q)
    k3 = to_heads(k)
    v3 = to_heads(v)

    # --- attention ------------------------------------------------------------
    scores = jnp.einsum('bqd,bkd->bqk', q3, k3,
                        preferred_element_type=jnp.float32)            # (Bb*H, S, S)
    if has_bias:
        bias = bias_ref[...].astype(jnp.float32)                       # (Bb, S, S)
        scores = (scores.reshape(Bb, H, S, S)
                  + bias[:, None, :, :]).reshape(Bb * H, S, S)

    m = jnp.max(scores, axis=-1, keepdims=True)
    p = jnp.exp(scores - m)
    denom = jnp.sum(p, axis=-1, keepdims=True)
    p = p * pl.reciprocal(denom, approx=True)

    attn = jnp.einsum('bqk,bkd->bqd', p.astype(jnp.bfloat16), v3,
                      preferred_element_type=jnp.float32)              # (Bb*H, S, dk)
    attn = jnp.transpose(attn.reshape(Bb, H, S, dk), (0, 2, 1, 3)).reshape(Bb * S, D)

    attn = jnp.dot(attn.astype(jnp.bfloat16), wo_ref[0],
                   preferred_element_type=jnp.float32) + bo_ref[0]

    # --- residual + norm1 -----------------------------------------------------
    x2 = _layer_norm(x2d + attn, g1_ref[0], bt1_ref[0])

    # --- FeedForward ----------------------------------------------------------
    h = jnp.dot(x2.astype(jnp.bfloat16), w1_ref[0],
                preferred_element_type=jnp.float32) + b1_ref[0]
    h = jnp.maximum(h, 0.0)
    ff = jnp.dot(h.astype(jnp.bfloat16), w2_ref[0],
                 preferred_element_type=jnp.float32) + b2_ref[0]

    # --- residual + norm2 -----------------------------------------------------
    out = _layer_norm(x2 + ff, g2_ref[0], bt2_ref[0])

    is_last = l == n_layers - 1

    @pl.when(jnp.logical_not(is_last))
    def _():
        o_ref[...] = out.reshape(Bb, S, D).astype(o_ref.dtype)

    # fused final (stack-level) LayerNorm on the last layer
    @pl.when(is_last)
    def _():
        o_ref[...] = _layer_norm(out, ng_ref[...], nb_ref[...]).reshape(
            Bb, S, D).astype(o_ref.dtype)


# ----------------------------------------------------------------------------
# Wrapper helpers
# ----------------------------------------------------------------------------
def _layer_param_spec(arr):
    """BlockSpec for a per-layer parameter stacked along a leading layer axis."""
    nz = (0,) * (arr.ndim - 1)
    return pl.BlockSpec((1,) + arr.shape[1:], lambda b, l, _nz=nz: (l,) + _nz)


def _tpu_vmem_bytes():
    try:
        return int(pltpu.get_tpu_info().vmem_capacity_bytes)
    except Exception:
        return 64 * 1024 * 1024        # conservative (v7x-sized) fallback


def _num_tensorcores():
    """Heuristic TC-per-chip count (megacore chips: v4 / v5p / v7x)."""
    try:
        kind = jax.local_devices()[0].device_kind.lower()
    except Exception:
        return 1
    if ("v7" in kind) or ("v4" in kind) or ("v5p" in kind):
        return 2
    return 1


def _vmem_estimate(bb, S, D, d_ff, H, per_layer_w_bytes, has_bias):
    """Rough per-grid-step VMEM footprint (includes attention intermediates)."""
    est = 2 * per_layer_w_bytes                        # all weights, double-buffered
    est += 2 * bb * S * D * 4                          # x block (double-buffered)
    est += 2 * bb * S * D * 4                          # out block (double-buffered)
    if has_bias:
        est += 2 * bb * S * S * 2                      # bf16 mask bias block
    est += bb * S * 3 * D * 4                          # qkv
    est += 3 * bb * S * D * 2                          # q3/k3/v3 (bf16)
    est += 2 * bb * H * S * S * 4                      # scores + p (f32)
    est += 2 * bb * S * D * 4                          # attn + x2
    est += bb * S * d_ff * 4                           # FFN hidden
    est += 2 << 20                                     # Mosaic internal scratch slack
    return est


def _pick_batch_block(B, S, D, d_ff, H, per_layer_w_bytes, has_bias, cap, n_tc):
    divisors = [d for d in range(B, 0, -1) if B % d == 0]
    if n_tc >= 2 and B >= 2:
        # keep the parallel batch grid axis >= n_tc so all TensorCores work
        pref = [d for d in divisors if B // d >= n_tc]
        divisors = pref + [d for d in divisors if d not in pref]
    for bb in divisors:
        if _vmem_estimate(bb, S, D, d_ff, H, per_layer_w_bytes, has_bias) <= cap:
            return bb
    return 1


def prep_params(params):
    """Host-side prep: fuse QKV, stack per-layer params, cast weights to bf16."""
    layers = params["layers"]

    def stack(fn, dtype=None):
        a = jnp.stack([fn(lp) for lp in layers])
        return a.astype(dtype) if dtype is not None else a

    return dict(
        wqkv=stack(lambda lp: jnp.concatenate([lp["wq"], lp["wk"], lp["wv"]], 1),
                   jnp.bfloat16),
        bqkv=stack(lambda lp: jnp.concatenate([lp["bq"], lp["bk"], lp["bv"]], 1)),
        wo=stack(lambda lp: lp["wo"], jnp.bfloat16),
        bo=stack(lambda lp: lp["bo"]),
        g1=stack(lambda lp: lp["g1"]),
        bt1=stack(lambda lp: lp["bt1"]),
        w1=stack(lambda lp: lp["w1"], jnp.bfloat16),
        b1=stack(lambda lp: lp["b1"]),
        w2=stack(lambda lp: lp["w2"], jnp.bfloat16),
        b2=stack(lambda lp: lp["b2"]),
        g2=stack(lambda lp: lp["g2"]),
        bt2=stack(lambda lp: lp["bt2"]),
        norm_g=params["norm_g"],
        norm_b=params["norm_b"],
    )


def encoder_forward(x, mask, dev_params, n_heads):
    B, S, D = x.shape
    L = dev_params["wqkv"].shape[0]
    d_ff = dev_params["w1"].shape[-1]
    dk = D // n_heads
    has_bias = mask is not None

    layer_names = ["wqkv", "bqkv", "wo", "bo", "g1", "bt1",
                   "w1", "b1", "w2", "b2", "g2", "bt2"]
    layer_args = [dev_params[n] for n in layer_names]

    def _nbytes(a):
        return int(a.size) * a.dtype.itemsize

    per_layer_w = sum(_nbytes(a) for a in layer_args) // L

    # Generation-aware VMEM cap: ~51 MiB on v7x, ~102 MiB on v5e/v6e.
    phys_vmem = _tpu_vmem_bytes()
    vmem_cap = int(phys_vmem * 0.8)
    n_tc = _num_tensorcores()

    Bb = _pick_batch_block(B, S, D, d_ff, n_heads, per_layer_w,
                           has_bias, vmem_cap, n_tc)

    args = [x]
    in_specs = [pl.BlockSpec((Bb, S, D), lambda b, l: (b, 0, 0))]   # x

    if has_bias:
        # Compact additive bias, bf16, computed once on the host side.
        # NOTE: assumes mask is broadcastable to (B, 1, S, S) (no per-head mask).
        bias = jnp.where(mask == 0, jnp.float32(-1e9), jnp.float32(0.0))
        bias = jnp.broadcast_to(bias, (B, 1, S, S)).reshape(B, S, S)
        bias = bias.astype(jnp.bfloat16)
        args.append(bias)
        in_specs.append(pl.BlockSpec((Bb, S, S), lambda b, l: (b, 0, 0)))

    args += layer_args + [dev_params["norm_g"], dev_params["norm_b"]]
    in_specs += [_layer_param_spec(a) for a in layer_args]
    in_specs += [pl.BlockSpec((1, D), lambda b, l: (0, 0)),         # final norm gamma
                 pl.BlockSpec((1, D), lambda b, l: (0, 0))]         # final norm beta

    # Advisory cost estimate so XLA can overlap surrounding ops with the kernel.
    flops = B * L * (2 * S * 3 * D * D          # QKV
                     + 4 * n_heads * S * S * dk  # QK^T + PV
                     + 2 * S * D * D             # Wo
                     + 4 * S * D * d_ff)         # FFN
    transcendentals = B * L * n_heads * S * S
    bytes_accessed = (L * per_layer_w
                      + B * S * D * 4 * 2
                      + (B * S * S * 2 if has_bias else 0))
    cost = pl.CostEstimate(flops=int(flops),
                           transcendentals=int(transcendentals),
                           bytes_accessed=int(bytes_accessed))

    return pl.pallas_call(
        functools.partial(encoder_stack_kernel, n_heads=n_heads, has_bias=has_bias),
        out_shape=jax.ShapeDtypeStruct((B, S, D), jnp.float32),
        grid_spec=pltpu.PrefetchScalarGridSpec(
            num_scalar_prefetch=0,
            grid=(B // Bb, L),
            in_specs=in_specs,
            out_specs=pl.BlockSpec((Bb, S, D), lambda b, l: (b, 0, 0)),
        ),
        compiler_params=pltpu.CompilerParams(
            dimension_semantics=("parallel", "arbitrary"),
            vmem_limit_bytes=vmem_cap),
        cost_estimate=cost,
    )(*args)


# ----------------------------------------------------------------------------
# Deterministic parameter construction + pure-JAX (f32) reference
# ----------------------------------------------------------------------------
def make_params(key, d_model, n_heads, d_ff, n_layers):
    def lin(k, din, dout):
        kw, kb = jax.random.split(k)
        w = jax.random.normal(kw, (din, dout), jnp.float32) * (1.0 / math.sqrt(din))
        b = jax.random.normal(kb, (1, dout), jnp.float32) * 0.01
        return w, b

    layers = []
    for _ in range(n_layers):
        key, *ks = jax.random.split(key, 7)
        wq, bq = lin(ks[0], d_model, d_model)
        wk, bk = lin(ks[1], d_model, d_model)
        wv, bv = lin(ks[2], d_model, d_model)
        wo, bo = lin(ks[3], d_model, d_model)
        w1, b1 = lin(ks[4], d_model, d_ff)
        w2, b2 = lin(ks[5], d_ff, d_model)
        layers.append(dict(
            wq=wq, bq=bq, wk=wk, bk=bk, wv=wv, bv=bv, wo=wo, bo=bo,
            g1=jnp.ones((1, d_model), jnp.float32),
            bt1=jnp.zeros((1, d_model), jnp.float32),
            w1=w1, b1=b1, w2=w2, b2=b2,
            g2=jnp.ones((1, d_model), jnp.float32),
            bt2=jnp.zeros((1, d_model), jnp.float32),
        ))
    return dict(layers=layers,
                norm_g=jnp.ones((1, d_model), jnp.float32),
                norm_b=jnp.zeros((1, d_model), jnp.float32))


def ref_encoder(x, mask, params, n_heads):
    def ln(z, g, b):
        mu = z.mean(-1, keepdims=True)
        var = ((z - mu) ** 2).mean(-1, keepdims=True)
        return (z - mu) / jnp.sqrt(var + LN_EPS) * g + b

    B, S, D = x.shape
    dk = D // n_heads
    for lp in params["layers"]:
        q = (x @ lp["wq"] + lp["bq"]).reshape(B, S, n_heads, dk).transpose(0, 2, 1, 3)
        k = (x @ lp["wk"] + lp["bk"]).reshape(B, S, n_heads, dk).transpose(0, 2, 1, 3)
        v = (x @ lp["wv"] + lp["bv"]).reshape(B, S, n_heads, dk).transpose(0, 2, 1, 3)
        s = jnp.einsum("bhqd,bhkd->bhqk", q, k) / math.sqrt(dk)
        if mask is not None:
            s = jnp.where(mask == 0, -1e9, s)
        p = jax.nn.softmax(s, axis=-1)
        a = jnp.einsum("bhqk,bhkd->bhqd", p, v).transpose(0, 2, 1, 3).reshape(B, S, D)
        a = a @ lp["wo"] + lp["bo"]
        x2 = ln(x + a, lp["g1"], lp["bt1"])
        ff = jnp.maximum(x2 @ lp["w1"] + lp["b1"], 0.0) @ lp["w2"] + lp["b2"]
        x = ln(x2 + ff, lp["g2"], lp["bt2"])
    return ln(x, params["norm_g"], params["norm_b"])


# ----------------------------------------------------------------------------
if __name__ == "__main__":
    B, S = 2, 8
    d_model, n_heads, d_ff, n_layers = 32, 4, 64, 2

    key = jax.random.PRNGKey(0)
    kx, kp = jax.random.split(key)
    x = jax.random.normal(kx, (B, S, d_model), jnp.float32)

    # Padding mask (torch semantics: positions where mask == 0 are masked out).
    lengths = jnp.array([8, 6], jnp.int32)
    mask = (jnp.arange(S)[None, None, None, :]
            < lengths[:, None, None, None]).astype(jnp.float32)      # (B, 1, 1, S)

    params = make_params(kp, d_model, n_heads, d_ff, n_layers)
    dev_params = prep_params(params)

    # masked path
    run_masked = jax.jit(lambda xx, mm: encoder_forward(xx, mm, dev_params, n_heads))
    out = jax.block_until_ready(run_masked(x, mask))
    ref = ref_encoder(x, mask, params, n_heads)
    assert out.shape == (B, S, d_model)
    # bf16 matmul operands + approx reciprocal => looser tolerance vs f32 ref
    assert jnp.max(jnp.abs(out - ref)) < 5e-2, "mismatch vs pure-JAX reference (masked)"

    # mask=None path (bias input skipped entirely)
    run_nomask = jax.jit(lambda xx: encoder_forward(xx, None, dev_params, n_heads))
    out2 = jax.block_until_ready(run_nomask(x))
    ref2 = ref_encoder(x, None, params, n_heads)
    assert jnp.max(jnp.abs(out2 - ref2)) < 5e-2, "mismatch vs pure-JAX reference (no mask)"

    print("KERNEL_OK")
</pallas_src>

<mosaic_0001>
module attributes {stable_mosaic.version = 11 : i64} {
  func.func @encoder_stack_kernel(%arg0: i32, %arg1: i32, %arg2: memref<2x8x32xf32, #tpu.memory_space<vmem>>, %arg3: memref<2x8x8xbf16, #tpu.memory_space<vmem>>, %arg4: memref<1x32x96xbf16, #tpu.memory_space<vmem>>, %arg5: memref<1x1x96xf32, #tpu.memory_space<vmem>>, %arg6: memref<1x32x32xbf16, #tpu.memory_space<vmem>>, %arg7: memref<1x1x32xf32, #tpu.memory_space<vmem>>, %arg8: memref<1x1x32xf32, #tpu.memory_space<vmem>>, %arg9: memref<1x1x32xf32, #tpu.memory_space<vmem>>, %arg10: memref<1x32x64xbf16, #tpu.memory_space<vmem>>, %arg11: memref<1x1x64xf32, #tpu.memory_space<vmem>>, %arg12: memref<1x64x32xbf16, #tpu.memory_space<vmem>>, %arg13: memref<1x1x32xf32, #tpu.memory_space<vmem>>, %arg14: memref<1x1x32xf32, #tpu.memory_space<vmem>>, %arg15: memref<1x1x32xf32, #tpu.memory_space<vmem>>, %arg16: memref<1x32xf32, #tpu.memory_space<vmem>>, %arg17: memref<1x32xf32, #tpu.memory_space<vmem>>, %arg18: memref<2x8x32xf32, #tpu.memory_space<vmem>>) attributes {dimension_semantics = [#tpu.dimension_semantics<parallel>, #tpu.dimension_semantics<arbitrary>], iteration_bounds = array<i64: 1, 2>, scalar_prefetch = 0 : i64, scratch_operands = 0 : i64, tpu.core_type = #tpu.core_type<tc>, window_params = [{transform_indices = @transform_0, window_bounds = array<i64: 2, 8, 32>}, {transform_indices = @transform_1, window_bounds = array<i64: 2, 8, 8>}, {transform_indices = @transform_2, window_bounds = array<i64: 1, 32, 96>}, {transform_indices = @transform_3, window_bounds = array<i64: 1, 1, 96>}, {transform_indices = @transform_4, window_bounds = array<i64: 1, 32, 32>}, {transform_indices = @transform_5, window_bounds = array<i64: 1, 1, 32>}, {transform_indices = @transform_6, window_bounds = array<i64: 1, 1, 32>}, {transform_indices = @transform_7, window_bounds = array<i64: 1, 1, 32>}, {transform_indices = @transform_8, window_bounds = array<i64: 1, 32, 64>}, {transform_indices = @transform_9, window_bounds = array<i64: 1, 1, 64>}, {transform_indices = @transform_10, window_bounds = array<i64: 1, 64, 32>}, {transform_indices = @transform_11, window_bounds = array<i64: 1, 1, 32>}, {transform_indices = @transform_12, window_bounds = array<i64: 1, 1, 32>}, {transform_indices = @transform_13, window_bounds = array<i64: 1, 1, 32>}, {pipeline_mode = #tpu.pipeline_mode<synchronous>, transform_indices = @transform_14, window_bounds = array<i64: 1, 32>}, {pipeline_mode = #tpu.pipeline_mode<synchronous>, transform_indices = @transform_15, window_bounds = array<i64: 1, 32>}, {transform_indices = @transform_16, window_bounds = array<i64: 2, 8, 32>}]} {
    %c0_i32 = arith.constant 0 : i32
    %0 = arith.cmpi eq, %arg1, %c0_i32 : i32
    %1 = arith.extui %0 : i1 to i32
    %c0_i32_0 = arith.constant 0 : i32
    %2 = arith.cmpi ne, %1, %c0_i32_0 : i32
    scf.if %2 {
      %c0_63 = arith.constant 0 : index
      %c0_64 = arith.constant 0 : index
      %c0_65 = arith.constant 0 : index
      %139 = vector.load %arg2[%c0_63, %c0_64, %c0_65] : memref<2x8x32xf32, #tpu.memory_space<vmem>>, vector<2x8x32xf32>
      %c0_66 = arith.constant 0 : index
      %c0_67 = arith.constant 0 : index
      %c0_68 = arith.constant 0 : index
      %140 = vector.load %arg18[%c0_66, %c0_67, %c0_68] : memref<2x8x32xf32, #tpu.memory_space<vmem>>, vector<2x8x32xf32>
      tpu.vector_store %arg18[%c0_66, %c0_67, %c0_68], %139 {strides = array<i32>} : memref<2x8x32xf32, #tpu.memory_space<vmem>>, vector<2x8x32xf32>,
    } else {
    }
    %c0 = arith.constant 0 : index
    %c0_1 = arith.constant 0 : index
    %c0_2 = arith.constant 0 : index
    %3 = vector.load %arg18[%c0, %c0_1, %c0_2] : memref<2x8x32xf32, #tpu.memory_space<vmem>>, vector<2x8x32xf32>
    %4 = vector.shape_cast %3 : vector<2x8x32xf32> to vector<16x32xf32>
    %5 = arith.truncf %4 : vector<16x32xf32> to vector<16x32xbf16>
    %c0_3 = arith.constant 0 : index
    %c0_4 = arith.constant 0 : index
    %c0_5 = arith.constant 0 : index
    %6 = vector.load %arg4[%c0_3, %c0_4, %c0_5] : memref<1x32x96xbf16, #tpu.memory_space<vmem>>, vector<1x32x96xbf16>
    %7 = vector.shape_cast %6 : vector<1x32x96xbf16> to vector<32x96xbf16>
    %cst = arith.constant dense<0.000000e+00> : vector<16x96xf32>
    %8 = tpu.matmul %5, %7, %cst {dimension_numbers = #tpu.dot_dimension_numbers<[1], [0], [0], [1], [0, 0, 1, 1], [], []>} : vector<16x32xbf16>, vector<32x96xbf16>, vector<16x96xf32> -> vector<16x96xf32>
    %c0_6 = arith.constant 0 : index
    %c0_7 = arith.constant 0 : index
    %c0_8 = arith.constant 0 : index
    %9 = vector.load %arg5[%c0_6, %c0_7, %c0_8] : memref<1x1x96xf32, #tpu.memory_space<vmem>>, vector<1x1x96xf32>
    %10 = vector.shape_cast %9 : vector<1x1x96xf32> to vector<1x96xf32>
    %11 = vector.broadcast %10 : vector<1x96xf32> to vector<16x96xf32>
    %12 = arith.addf %8, %11 : vector<16x96xf32>
    %13 = vector.extract_strided_slice %12 {offsets = [0, 0], sizes = [16, 32], strides = [1, 1]} : vector<16x96xf32> to vector<16x32xf32>
    %cst_9 = arith.constant 0.353553385 : f32
    %14 = vector.broadcast %cst_9 : f32 to vector<16x32xf32>
    %15 = arith.mulf %13, %14 : vector<16x32xf32>
    %16 = vector.extract_strided_slice %12 {offsets = [0, 32], sizes = [16, 32], strides = [1, 1]} : vector<16x96xf32> to vector<16x32xf32>
    %17 = vector.extract_strided_slice %12 {offsets = [0, 64], sizes = [16, 32], strides = [1, 1]} : vector<16x96xf32> to vector<16x32xf32>
    %18 = vector.shape_cast %15 : vector<16x32xf32> to vector<2x8x4x8xf32>
    %19 = tpu.transpose %18, [0, 2, 1, 3] : vector<2x8x4x8xf32> -> vector<2x4x8x8xf32>
    %20 = vector.shape_cast %19 : vector<2x4x8x8xf32> to vector<8x8x8xf32>
    %21 = arith.truncf %20 : vector<8x8x8xf32> to vector<8x8x8xbf16>
    %22 = vector.shape_cast %16 : vector<16x32xf32> to vector<2x8x4x8xf32>
    %23 = tpu.transpose %22, [0, 2, 1, 3] : vector<2x8x4x8xf32> -> vector<2x4x8x8xf32>
    %24 = vector.shape_cast %23 : vector<2x4x8x8xf32> to vector<8x8x8xf32>
    %25 = arith.truncf %24 : vector<8x8x8xf32> to vector<8x8x8xbf16>
    %26 = vector.shape_cast %17 : vector<16x32xf32> to vector<2x8x4x8xf32>
    %27 = tpu.transpose %26, [0, 2, 1, 3] : vector<2x8x4x8xf32> -> vector<2x4x8x8xf32>
    %28 = vector.shape_cast %27 : vector<2x4x8x8xf32> to vector<8x8x8xf32>
    %29 = arith.truncf %28 : vector<8x8x8xf32> to vector<8x8x8xbf16>
    "tpu.trace_start"() <{level = 10 : i32, message = "bqd,bkd->bqk"}> : () -> ()
    %cst_10 = arith.constant dense<0.000000e+00> : vector<8x8x8xf32>
    %30 = tpu.matmul %21, %25, %cst_10 {dimension_numbers = #tpu.dot_dimension_numbers<[2], [2], [1], [1], [0, 0, 0, 1, 1, 1], [0], [0]>} : vector<8x8x8xbf16>, vector<8x8x8xbf16>, vector<8x8x8xf32> -> vector<8x8x8xf32>
    "tpu.trace_stop"() : () -> ()
    %c0_11 = arith.constant 0 : index
    %c0_12 = arith.constant 0 : index
    %c0_13 = arith.constant 0 : index
    %31 = vector.load %arg3[%c0_11, %c0_12, %c0_13] : memref<2x8x8xbf16, #tpu.memory_space<vmem>>, vector<2x8x8xbf16>
    %32 = arith.extf %31 : vector<2x8x8xbf16> to vector<2x8x8xf32>
    %33 = vector.shape_cast %30 : vector<8x8x8xf32> to vector<2x4x8x8xf32>
    %34 = vector.shape_cast %32 : vector<2x8x8xf32> to vector<2x1x8x8xf32>
    %35 = vector.broadcast %34 : vector<2x1x8x8xf32> to vector<2x4x8x8xf32>
    %36 = arith.addf %33, %35 : vector<2x4x8x8xf32>
    %37 = vector.shape_cast %36 : vector<2x4x8x8xf32> to vector<8x8x8xf32>
    %cst_14 = arith.constant dense<0xFF800000> : vector<8x8xf32>
    %38 = vector.multi_reduction <maximumf>, %37, %cst_14 [2] : vector<8x8x8xf32> to vector<8x8xf32>
    %39 = vector.shape_cast %38 : vector<8x8xf32> to vector<8x8x1xf32>
    %40 = vector.broadcast %39 : vector<8x8x1xf32> to vector<8x8x8xf32>
    %41 = arith.subf %37, %40 : vector<8x8x8xf32>
    %42 = math.exp %41 : vector<8x8x8xf32>
    %cst_15 = arith.constant dense<0.000000e+00> : vector<8x8xf32>
    %43 = vector.multi_reduction <add>, %42, %cst_15 [2] : vector<8x8x8xf32> to vector<8x8xf32>
    %44 = vector.shape_cast %43 : vector<8x8xf32> to vector<8x8x1xf32>
    %45 = tpu.reciprocal %44 {approx = true} : vector<8x8x1xf32> -> vector<8x8x1xf32>
    %46 = vector.broadcast %45 : vector<8x8x1xf32> to vector<8x8x8xf32>
    %47 = arith.mulf %42, %46 : vector<8x8x8xf32>
    %48 = arith.truncf %47 : vector<8x8x8xf32> to vector<8x8x8xbf16>
    "tpu.trace_start"() <{level = 10 : i32, message = "bqk,bkd->bqd"}> : () -> ()
    %cst_16 = arith.constant dense<0.000000e+00> : vector<8x8x8xf32>
    %49 = tpu.matmul %48, %29, %cst_16 {dimension_numbers = #tpu.dot_dimension_numbers<[2], [1], [1], [2], [0, 0, 0, 1, 1, 2], [0], [0]>} : vector<8x8x8xbf16>, vector<8x8x8xbf16>, vector<8x8x8xf32> -> vector<8x8x8xf32>
    "tpu.trace_stop"() : () -> ()
    %50 = vector.shape_cast %49 : vector<8x8x8xf32> to vector<2x4x8x8xf32>
    %51 = tpu.transpose %50, [0, 2, 1, 3] : vector<2x4x8x8xf32> -> vector<2x8x4x8xf32>
    %52 = vector.shape_cast %51 : vector<2x8x4x8xf32> to vector<16x32xf32>
    %53 = arith.truncf %52 : vector<16x32xf32> to vector<16x32xbf16>
    %c0_17 = arith.constant 0 : index
    %c0_18 = arith.constant 0 : index
    %c0_19 = arith.constant 0 : index
    %54 = vector.load %arg6[%c0_17, %c0_18, %c0_19] : memref<1x32x32xbf16, #tpu.memory_space<vmem>>, vector<1x32x32xbf16>
    %55 = vector.shape_cast %54 : vector<1x32x32xbf16> to vector<32x32xbf16>
    %cst_20 = arith.constant dense<0.000000e+00> : vector<16x32xf32>
    %56 = tpu.matmul %53, %55, %cst_20 {dimension_numbers = #tpu.dot_dimension_numbers<[1], [0], [0], [1], [0, 0, 1, 1], [], []>} : vector<16x32xbf16>, vector<32x32xbf16>, vector<16x32xf32> -> vector<16x32xf32>
    %c0_21 = arith.constant 0 : index
    %c0_22 = arith.constant 0 : index
    %c0_23 = arith.constant 0 : index
    %57 = vector.load %arg7[%c0_21, %c0_22, %c0_23] : memref<1x1x32xf32, #tpu.memory_space<vmem>>, vector<1x1x32xf32>
    %58 = vector.shape_cast %57 : vector<1x1x32xf32> to vector<1x32xf32>
    %59 = vector.broadcast %58 : vector<1x32xf32> to vector<16x32xf32>
    %60 = arith.addf %56, %59 : vector<16x32xf32>
    %61 = arith.addf %4, %60 : vector<16x32xf32>
    %c0_24 = arith.constant 0 : index
    %c0_25 = arith.constant 0 : index
    %c0_26 = arith.constant 0 : index
    %62 = vector.load %arg8[%c0_24, %c0_25, %c0_26] : memref<1x1x32xf32, #tpu.memory_space<vmem>>, vector<1x1x32xf32>
    %63 = vector.shape_cast %62 : vector<1x1x32xf32> to vector<1x32xf32>
    %c0_27 = arith.constant 0 : index
    %c0_28 = arith.constant 0 : index
    %c0_29 = arith.constant 0 : index
    %64 = vector.load %arg9[%c0_27, %c0_28, %c0_29] : memref<1x1x32xf32, #tpu.memory_space<vmem>>, vector<1x1x32xf32>
    %65 = vector.shape_cast %64 : vector<1x1x32xf32> to vector<1x32xf32>
    %cst_30 = arith.constant dense<0.000000e+00> : vector<16xf32>
    %66 = vector.multi_reduction <add>, %61, %cst_30 [1] : vector<16x32xf32> to vector<16xf32>
    %67 = vector.shape_cast %66 : vector<16xf32> to vector<16x1xf32>
    %cst_31 = arith.constant 3.200000e+01 : f32
    %68 = vector.broadcast %cst_31 : f32 to vector<16x1xf32>
    %69 = arith.divf %67, %68 : vector<16x1xf32>
    %70 = vector.broadcast %69 : vector<16x1xf32> to vector<16x32xf32>
    %71 = arith.subf %61, %70 : vector<16x32xf32>
    %72 = arith.mulf %71, %71 : vector<16x32xf32>
    %cst_32 = arith.constant dense<0.000000e+00> : vector<16xf32>
    %73 = vector.multi_reduction <add>, %72, %cst_32 [1] : vector<16x32xf32> to vector<16xf32>
    %74 = vector.shape_cast %73 : vector<16xf32> to vector<16x1xf32>
    %cst_33 = arith.constant 3.200000e+01 : f32
    %75 = vector.broadcast %cst_33 : f32 to vector<16x1xf32>
    %76 = arith.divf %74, %75 : vector<16x1xf32>
    %77 = vector.broadcast %69 : vector<16x1xf32> to vector<16x32xf32>
    %78 = arith.subf %61, %77 : vector<16x32xf32>
    %cst_34 = arith.constant 9.99999974E-6 : f32
    %79 = vector.broadcast %cst_34 : f32 to vector<16x1xf32>
    %80 = arith.addf %76, %79 : vector<16x1xf32>
    %81 = math.rsqrt %80 : vector<16x1xf32>
    %82 = vector.broadcast %81 : vector<16x1xf32> to vector<16x32xf32>
    %83 = arith.mulf %78, %82 : vector<16x32xf32>
    %84 = vector.broadcast %63 : vector<1x32xf32> to vector<16x32xf32>
    %85 = arith.mulf %83, %84 : vector<16x32xf32>
    %86 = vector.broadcast %65 : vector<1x32xf32> to vector<16x32xf32>
    %87 = arith.addf %85, %86 : vector<16x32xf32>
    %88 = arith.truncf %87 : vector<16x32xf32> to vector<16x32xbf16>
    %c0_35 = arith.constant 0 : index
    %c0_36 = arith.constant 0 : index
    %c0_37 = arith.constant 0 : index
    %89 = vector.load %arg10[%c0_35, %c0_36, %c0_37] : memref<1x32x64xbf16, #tpu.memory_space<vmem>>, vector<1x32x64xbf16>
    %90 = vector.shape_cast %89 : vector<1x32x64xbf16> to vector<32x64xbf16>
    %cst_38 = arith.constant dense<0.000000e+00> : vector<16x64xf32>
    %91 = tpu.matmul %88, %90, %cst_38 {dimension_numbers = #tpu.dot_dimension_numbers<[1], [0], [0], [1], [0, 0, 1, 1], [], []>} : vector<16x32xbf16>, vector<32x64xbf16>, vector<16x64xf32> -> vector<16x64xf32>
    %c0_39 = arith.constant 0 : index
    %c0_40 = arith.constant 0 : index
    %c0_41 = arith.constant 0 : index
    %92 = vector.load %arg11[%c0_39, %c0_40, %c0_41] : memref<1x1x64xf32, #tpu.memory_space<vmem>>, vector<1x1x64xf32>
    %93 = vector.shape_cast %92 : vector<1x1x64xf32> to vector<1x64xf32>
    %94 = vector.broadcast %93 : vector<1x64xf32> to vector<16x64xf32>
    %95 = arith.addf %91, %94 : vector<16x64xf32>
    %cst_42 = arith.constant 0.000000e+00 : f32
    %96 = vector.broadcast %cst_42 : f32 to vector<16x64xf32>
    %97 = arith.maximumf %95, %96 : vector<16x64xf32>
    %98 = arith.truncf %97 : vector<16x64xf32> to vector<16x64xbf16>
    %c0_43 = arith.constant 0 : index
    %c0_44 = arith.constant 0 : index
    %c0_45 = arith.constant 0 : index
    %99 = vector.load %arg12[%c0_43, %c0_44, %c0_45] : memref<1x64x32xbf16, #tpu.memory_space<vmem>>, vector<1x64x32xbf16>
    %100 = vector.shape_cast %99 : vector<1x64x32xbf16> to vector<64x32xbf16>
    %cst_46 = arith.constant dense<0.000000e+00> : vector<16x32xf32>
    %101 = tpu.matmul %98, %100, %cst_46 {dimension_numbers = #tpu.dot_dimension_numbers<[1], [0], [0], [1], [0, 0, 1, 1], [], []>} : vector<16x64xbf16>, vector<64x32xbf16>, vector<16x32xf32> -> vector<16x32xf32>
    %c0_47 = arith.constant 0 : index
    %c0_48 = arith.constant 0 : index
    %c0_49 = arith.constant 0 : index
    %102 = vector.load %arg13[%c0_47, %c0_48, %c0_49] : memref<1x1x32xf32, #tpu.memory_space<vmem>>, vector<1x1x32xf32>
    %103 = vector.shape_cast %102 : vector<1x1x32xf32> to vector<1x32xf32>
    %104 = vector.broadcast %103 : vector<1x32xf32> to vector<16x32xf32>
    %105 = arith.addf %101, %104 : vector<16x32xf32>
    %106 = arith.addf %87, %105 : vector<16x32xf32>
    %c0_50 = arith.constant 0 : index
    %c0_51 = arith.constant 0 : index
    %c0_52 = arith.constant 0 : index
    %107 = vector.load %arg14[%c0_50, %c0_51, %c0_52] : memref<1x1x32xf32, #tpu.memory_space<vmem>>, vector<1x1x32xf32>
    %108 = vector.shape_cast %107 : vector<1x1x32xf32> to vector<1x32xf32>
    %c0_53 = arith.constant 0 : index
    %c0_54 = arith.constant 0 : index
    %c0_55 = arith.constant 0 : index
    %109 = vector.load %arg15[%c0_53, %c0_54, %c0_55] : memref<1x1x32xf32, #tpu.memory_space<vmem>>, vector<1x1x32xf32>
    %110 = vector.shape_cast %109 : vector<1x1x32xf32> to vector<1x32xf32>
    %cst_56 = arith.constant dense<0.000000e+00> : vector<16xf32>
    %111 = vector.multi_reduction <add>, %106, %cst_56 [1] : vector<16x32xf32> to vector<16xf32>
    %112 = vector.shape_cast %111 : vector<16xf32> to vector<16x1xf32>
    %cst_57 = arith.constant 3.200000e+01 : f32
    %113 = vector.broadcast %cst_57 : f32 to vector<16x1xf32>
    %114 = arith.divf %112, %113 : vector<16x1xf32>
    %115 = vector.broadcast %114 : vector<16x1xf32> to vector<16x32xf32>
    %116 = arith.subf %106, %115 : vector<16x32xf32>
    %117 = arith.mulf %116, %116 : vector<16x32xf32>
    %cst_58 = arith.constant dense<0.000000e+00> : vector<16xf32>
    %118 = vector.multi_reduction <add>, %117, %cst_58 [1] : vector<16x32xf32> to vector<16xf32>
    %119 = vector.shape_cast %118 : vector<16xf32> to vector<16x1xf32>
    %cst_59 = arith.constant 3.200000e+01 : f32
    %120 = vector.broadcast %cst_59 : f32 to vector<16x1xf32>
    %121 = arith.divf %119, %120 : vector<16x1xf32>
    %122 = vector.broadcast %114 : vector<16x1xf32> to vector<16x32xf32>
    %123 = arith.subf %106, %122 : vector<16x32xf32>
    %cst_60 = arith.constant 9.99999974E-6 : f32
    %124 = vector.broadcast %cst_60 : f32 to vector<16x1xf32>
    %125 = arith.addf %121, %124 : vector<16x1xf32>
    %126 = math.rsqrt %125 : vector<16x1xf32>
    %127 = vector.broadcast %126 : vector<16x1xf32> to vector<16x32xf32>
    %128 = arith.mulf %123, %127 : vector<16x32xf32>
    %129 = vector.broadcast %108 : vector<1x32xf32> to vector<16x32xf32>
    %130 = arith.mulf %128, %129 : vector<16x32xf32>
    %131 = vector.broadcast %110 : vector<1x32xf32> to vector<16x32xf32>
    %132 = arith.addf %130, %131 : vector<16x32xf32>
    %c1_i32 = arith.constant 1 : i32
    %133 = arith.cmpi eq, %arg1, %c1_i32 : i32
    %true = arith.constant true
    %134 = arith.xori %133, %true : i1
    %135 = arith.extui %134 : i1 to i32
    %c0_i32_61 = arith.constant 0 : i32
    %136 = arith.cmpi ne, %135, %c0_i32_61 : i32
    scf.if %136 {
      %139 = vector.shape_cast %132 : vector<16x32xf32> to vector<2x8x32xf32>
      %c0_63 = arith.constant 0 : index
      %c0_64 = arith.constant 0 : index
      %c0_65 = arith.constant 0 : index
      %140 = vector.load %arg18[%c0_63, %c0_64, %c0_65] : memref<2x8x32xf32, #tpu.memory_space<vmem>>, vector<2x8x32xf32>
      tpu.vector_store %arg18[%c0_63, %c0_64, %c0_65], %139 {strides = array<i32>} : memref<2x8x32xf32, #tpu.memory_space<vmem>>, vector<2x8x32xf32>,
    } else {
    }
    %137 = arith.extui %133 : i1 to i32
    %c0_i32_62 = arith.constant 0 : i32
    %138 = arith.cmpi ne, %137, %c0_i32_62 : i32
    scf.if %138 {
      %c0_63 = arith.constant 0 : index
      %c0_64 = arith.constant 0 : index
      %139 = vector.load %arg16[%c0_63, %c0_64] : memref<1x32xf32, #tpu.memory_space<vmem>>, vector<1x32xf32>
      %c0_65 = arith.constant 0 : index
      %c0_66 = arith.constant 0 : index
      %140 = vector.load %arg17[%c0_65, %c0_66] : memref<1x32xf32, #tpu.memory_space<vmem>>, vector<1x32xf32>
      %cst_67 = arith.constant dense<0.000000e+00> : vector<16xf32>
      %141 = vector.multi_reduction <add>, %132, %cst_67 [1] : vector<16x32xf32> to vector<16xf32>
      %142 = vector.shape_cast %141 : vector<16xf32> to vector<16x1xf32>
      %cst_68 = arith.constant 3.200000e+01 : f32
      %143 = vector.broadcast %cst_68 : f32 to vector<16x1xf32>
      %144 = arith.divf %142, %143 : vector<16x1xf32>
      %145 = vector.broadcast %144 : vector<16x1xf32> to vector<16x32xf32>
      %146 = arith.subf %132, %145 : vector<16x32xf32>
      %147 = arith.mulf %146, %146 : vector<16x32xf32>
      %cst_69 = arith.constant dense<0.000000e+00> : vector<16xf32>
      %148 = vector.multi_reduction <add>, %147, %cst_69 [1] : vector<16x32xf32> to vector<16xf32>
      %149 = vector.shape_cast %148 : vector<16xf32> to vector<16x1xf32>
      %cst_70 = arith.constant 3.200000e+01 : f32
      %150 = vector.broadcast %cst_70 : f32 to vector<16x1xf32>
      %151 = arith.divf %149, %150 : vector<16x1xf32>
      %152 = vector.broadcast %144 : vector<16x1xf32> to vector<16x32xf32>
      %153 = arith.subf %132, %152 : vector<16x32xf32>
      %cst_71 = arith.constant 9.99999974E-6 : f32
      %154 = vector.broadcast %cst_71 : f32 to vector<16x1xf32>
      %155 = arith.addf %151, %154 : vector<16x1xf32>
      %156 = math.rsqrt %155 : vector<16x1xf32>
      %157 = vector.broadcast %156 : vector<16x1xf32> to vector<16x32xf32>
      %158 = arith.mulf %153, %157 : vector<16x32xf32>
      %159 = vector.broadcast %139 : vector<1x32xf32> to vector<16x32xf32>
      %160 = arith.mulf %158, %159 : vector<16x32xf32>
      %161 = vector.broadcast %140 : vector<1x32xf32> to vector<16x32xf32>
      %162 = arith.addf %160, %161 : vector<16x32xf32>
      %163 = vector.shape_cast %162 : vector<16x32xf32> to vector<2x8x32xf32>
      %c0_72 = arith.constant 0 : index
      %c0_73 = arith.constant 0 : index
      %c0_74 = arith.constant 0 : index
      %164 = vector.load %arg18[%c0_72, %c0_73, %c0_74] : memref<2x8x32xf32, #tpu.memory_space<vmem>>, vector<2x8x32xf32>
      tpu.vector_store %arg18[%c0_72, %c0_73, %c0_74], %163 {strides = array<i32>} : memref<2x8x32xf32, #tpu.memory_space<vmem>>, vector<2x8x32xf32>,
    } else {
    }
    return
  }
  func.func @transform_0(%arg0: i32, %arg1: i32) -> (i32, i32, i32) {
    %c0_i32 = arith.constant 0 : i32
    %c0_i32_0 = arith.constant 0 : i32
    %c0_i32_1 = arith.constant 0 : i32
    return %arg0, %c0_i32, %c0_i32_0 : i32, i32, i32
  }
  func.func @transform_1(%arg0: i32, %arg1: i32) -> (i32, i32, i32) {
    %c0_i32 = arith.constant 0 : i32
    %c0_i32_0 = arith.constant 0 : i32
    %c0_i32_1 = arith.constant 0 : i32
    return %arg0, %c0_i32, %c0_i32_0 : i32, i32, i32
  }
  func.func @transform_2(%arg0: i32, %arg1: i32) -> (i32, i32, i32) {
    %c0_i32 = arith.constant 0 : i32
    %c0_i32_0 = arith.constant 0 : i32
    %c0_i32_1 = arith.constant 0 : i32
    return %arg1, %c0_i32, %c0_i32_0 : i32, i32, i32
  }
  func.func @transform_3(%arg0: i32, %arg1: i32) -> (i32, i32, i32) {
    %c0_i32 = arith.constant 0 : i32
    %c0_i32_0 = arith.constant 0 : i32
    %c0_i32_1 = arith.constant 0 : i32
    return %arg1, %c0_i32, %c0_i32_0 : i32, i32, i32
  }
  func.func @transform_4(%arg0: i32, %arg1: i32) -> (i32, i32, i32) {
    %c0_i32 = arith.constant 0 : i32
    %c0_i32_0 = arith.constant 0 : i32
    %c0_i32_1 = arith.constant 0 : i32
    return %arg1, %c0_i32, %c0_i32_0 : i32, i32, i32
  }
  func.func @transform_5(%arg0: i32, %arg1: i32) -> (i32, i32, i32) {
    %c0_i32 = arith.constant 0 : i32
    %c0_i32_0 = arith.constant 0 : i32
    %c0_i32_1 = arith.constant 0 : i32
    return %arg1, %c0_i32, %c0_i32_0 : i32, i32, i32
  }
  func.func @transform_6(%arg0: i32, %arg1: i32) -> (i32, i32, i32) {
    %c0_i32 = arith.constant 0 : i32
    %c0_i32_0 = arith.constant 0 : i32
    %c0_i32_1 = arith.constant 0 : i32
    return %arg1, %c0_i32, %c0_i32_0 : i32, i32, i32
  }
  func.func @transform_7(%arg0: i32, %arg1: i32) -> (i32, i32, i32) {
    %c0_i32 = arith.constant 0 : i32
    %c0_i32_0 = arith.constant 0 : i32
    %c0_i32_1 = arith.constant 0 : i32
    return %arg1, %c0_i32, %c0_i32_0 : i32, i32, i32
  }
  func.func @transform_8(%arg0: i32, %arg1: i32) -> (i32, i32, i32) {
    %c0_i32 = arith.constant 0 : i32
    %c0_i32_0 = arith.constant 0 : i32
    %c0_i32_1 = arith.constant 0 : i32
    return %arg1, %c0_i32, %c0_i32_0 : i32, i32, i32
  }
  func.func @transform_9(%arg0: i32, %arg1: i32) -> (i32, i32, i32) {
    %c0_i32 = arith.constant 0 : i32
    %c0_i32_0 = arith.constant 0 : i32
    %c0_i32_1 = arith.constant 0 : i32
    return %arg1, %c0_i32, %c0_i32_0 : i32, i32, i32
  }
  func.func @transform_10(%arg0: i32, %arg1: i32) -> (i32, i32, i32) {
    %c0_i32 = arith.constant 0 : i32
    %c0_i32_0 = arith.constant 0 : i32
    %c0_i32_1 = arith.constant 0 : i32
    return %arg1, %c0_i32, %c0_i32_0 : i32, i32, i32
  }
  func.func @transform_11(%arg0: i32, %arg1: i32) -> (i32, i32, i32) {
    %c0_i32 = arith.constant 0 : i32
    %c0_i32_0 = arith.constant 0 : i32
    %c0_i32_1 = arith.constant 0 : i32
    return %arg1, %c0_i32, %c0_i32_0 : i32, i32, i32
  }
  func.func @transform_12(%arg0: i32, %arg1: i32) -> (i32, i32, i32) {
    %c0_i32 = arith.constant 0 : i32
    %c0_i32_0 = arith.constant 0 : i32
    %c0_i32_1 = arith.constant 0 : i32
    return %arg1, %c0_i32, %c0_i32_0 : i32, i32, i32
  }
  func.func @transform_13(%arg0: i32, %arg1: i32) -> (i32, i32, i32) {
    %c0_i32 = arith.constant 0 : i32
    %c0_i32_0 = arith.constant 0 : i32
    %c0_i32_1 = arith.constant 0 : i32
    return %arg1, %c0_i32, %c0_i32_0 : i32, i32, i32
  }
  func.func @transform_14(%arg0: i32, %arg1: i32) -> (i32, i32) {
    %c0_i32 = arith.constant 0 : i32
    %c0_i32_0 = arith.constant 0 : i32
    %c0_i32_1 = arith.constant 0 : i32
    return %c0_i32, %c0_i32_0 : i32, i32
  }
  func.func @transform_15(%arg0: i32, %arg1: i32) -> (i32, i32) {
    %c0_i32 = arith.constant 0 : i32
    %c0_i32_0 = arith.constant 0 : i32
    %c0_i32_1 = arith.constant 0 : i32
    return %c0_i32, %c0_i32_0 : i32, i32
  }
  func.func @transform_16(%arg0: i32, %arg1: i32) -> (i32, i32, i32) {
    %c0_i32 = arith.constant 0 : i32
    %c0_i32_0 = arith.constant 0 : i32
    %c0_i32_1 = arith.constant 0 : i32
    return %arg0, %c0_i32, %c0_i32_0 : i32, i32, i32
  }
}

</mosaic_0001>

<bundles_post_ra>
// kernel: _lambda_.1
= control target key start
LH: loop header
LB: loop body
LE: loop exit
PB: predicated region body
PF: predicated region fallthrough
CT: control target
= control target key end

     0   :  { %s5062_s0 = inlined_call_operand.vmem [shape: f32[2,8,32], index: 0, kind: input, shape index: {}]   ;;  %s5063_s1 = inlined_call_operand.vmem [shape: bf16[2,8,8], index: 1, kind: input, shape index: {}]   ;;  %s5064_s2 = inlined_call_operand.hbm [shape: bf16[2,32,96], index: 2, kind: input, shape index: {}]   ;;  %s5065_s3 = inlined_call_operand.vmem [shape: f32[2,1,96], index: 3, kind: input, shape index: {}]   ;;  %s5066_s4 = inlined_call_operand.hbm [shape: bf16[2,32,32], index: 4, kind: input, shape index: {}]   ;;  %s5067_s5 = inlined_call_operand.vmem [shape: f32[2,1,32], index: 5, kind: input, shape index: {}]   ;;  %s5068_s6 = inlined_call_operand.vmem [shape: f32[2,1,32], index: 6, kind: input, shape index: {}, may-alias: {6,12}]   ;;  %s5069_s7 = inlined_call_operand.vmem [shape: f32[2,1,32], index: 7, kind: input, shape index: {}, may-alias: {7,13}]   ;;  %s5070_s8 = inlined_call_operand.hbm [shape: bf16[2,32,64], index: 8, kind: input, shape index: {}]   ;;  %s5071_s9 = inlined_call_operand.vmem [shape: f32[2,1,64], index: 9, kind: input, shape index: {}]   ;;  %s5072_s10 = inlined_call_operand.vmem [shape: bf16[2,64,32], index: 10, kind: input, shape index: {}]   ;;  %s5073_s11 = inlined_call_operand.vmem [shape: f32[2,1,32], index: 11, kind: input, shape index: {}]   ;;  %s5074_s12 = inlined_call_operand.vmem [shape: f32[2,1,32], index: 12, kind: input, shape index: {}, may-alias: {6,12}]   ;;  %s5075_s13 = inlined_call_operand.vmem [shape: f32[2,1,32], index: 13, kind: input, shape index: {}, may-alias: {7,13}]   ;;  %s5076_s14 = inlined_call_operand.vmem [shape: f32[1,32], index: 14, kind: input, shape index: {}]   ;;  %s5077_s15 = inlined_call_operand.vmem [shape: f32[1,32], index: 15, kind: input, shape index: {}]   ;;  %s5078_s16 = inlined_call_operand.hbm [shape: f32[2,8,32], index: 16, kind: output, shape index: {}]  }
   0x1   :  { %5090 = sst [smem:[#allocation16_spill]] %s5062_s0 }
   0x2   :  { %5091 = sst [smem:[#allocation17_spill]] %s5063_s1 }
   0x3   :  { %5092 = sst [smem:[#allocation18_spill]] %s5064_s2 }
   0x4   :  { %5093 = sst [smem:[#allocation19_spill]] %s5066_s4 }
   0x5   :  { %5094 = sst [smem:[#allocation20_spill]] %s5070_s8 }
   0x6   :  { %5095 = sst [smem:[#allocation21_spill]] %s5074_s12 }
   0x7   :  { %5096 = sst [smem:[#allocation22_spill]] %s5075_s13 }
   0x8   :  { %5097 = sst [smem:[#allocation23_spill]] %s5076_s14 }
   0x9   :  { %5098 = sst [smem:[#allocation24_spill]] %s5077_s15 }
   0xa   :  { %5099 = sst [smem:[#allocation25_spill]] %s5078_s16 }
   0xb   :  { %21 = vsyncpa [#allocation3], 0 }
   0xc   :  { %23 = vsyncpa [#allocation3 + $0x1], 0 }
   0xd   :  { %24 = vsyncpa [#allocation6], 0 }
   0xe   :  { %26 = vsyncpa [#allocation6 + $0x1], 0 }
   0xf   :  { %27 = vsyncpa [#allocation4], 0  ;;  %s4263_s21 = smov 0   ;;  %s4265_s22 = smov 0  }
  0x10   :  { %s4267_s23 = smov 0   ;;  %s4269_s24 = smov 0  }
  0x11   :  { %s4271_s25 = smov 0   ;;  %s4273_s26 = smov 0  }
  0x12 LB: > { %5100 = sst [smem:[#allocation12_spill]] %s4153_s25  ;;  %s4292_s27 = sadd.s32 4294967295, %s4157_s26   ;;  %s4157_s26 = sphi %s4273_s26, %s33_s26   ;;  %s4153_s25 = sphi %s4271_s25, %s5137_s25   ;;  %s4149_s24 = sphi %s4269_s24, %s5136_s24   ;;  %s4145_s23 = sphi %s4267_s23, %s5140_s23   ;;  %s4141_s22 = sphi %s4265_s22, %s5139_s22   ;;  %s4137_s21 = sphi %s4263_s21, %s5138_s21  }
  0x13   : > { %5101 = sst [smem:[#allocation13_spill]] %s4157_s26  ;;  %s42_s28 = sadd.s32 1, %s4153_s25 }
  0x14   : > { %p43_p0 = scmp.ge.s32.totalorder %s42_s28, 2  ;;  %s104_s29 = sadd.s32 1, %s4145_s23 }
  0x15   : > { %p111_p1 = scmp.ne.s32.totalorder %s4145_s23, %s4141_s22  ;;  %p112_p2 = scmp.eq.s32.totalorder %s4157_s26, 0 }
  0x16   : > { %s5142_s28 = smov (%p43_p0, %s42_s28), 0  ;;  %p117_p4 = scmp.ne.s32.totalorder %s4141_s22, %s4137_s21 }
  0x17   : > { %5102 = sst [smem:[#allocation14_spill]] %s5142_s28  ;;  %p113_p3 = por %p112_p2, %p111_p1 }
  0x18   : > { %s101_s30 = ssub.s32 %s4153_s25, %s5142_s28  ;;  %p118_p5 = scmp.eq.s32.totalorder %s4292_s27, 0 }
  0x19   : > { %p102_p6 = scmp.eq.s32.totalorder %s101_s30, 0  ;;  %p3845_p8 = scmp.lt.s32.totalorder %s4157_s26, 2 }
  0x1a   : > { %p4305_p7 = por %p118_p5, %p117_p4  ;;  %s5083_s18 = sand.u32 1, %s4145_s23  }
  0x1b   : > { %s4311_s17 = scalar_select %p102_p6, %s4145_s23, %s104_s29  }
  0x1c   : > { %s5103_s0 = scalar_select %p4305_p7, 1, 0 }
  0x1d   : > { %5104 = sst [smem:[#allocation15_spill]] %s4311_s17  ;;  %s4315_s19 = sshll.u32 %s4153_s25, 8 }
  0x1e   : > { %s4319_s20 = sshll.u32 %s5083_s18, 4  ;;  %p4321_p9 = pnand %p3845_p8, %p113_p3 }
  0x1f   : > { %s546_s30 = sand.u32 1, %s4157_s26   ;;  %s5106_s4 = sld [smem:[#allocation19_spill]] }
  0x20   : > { %s550_s29 = scalar_lea.vmem [#allocation5], %s4319_s20  ;;  %s4336_s18 = scalar_lea.sflag [#allocation6], %s546_s30 }
  0x21   : > { %s557_s25 = sshll.u32 %s550_s29, 4  ;;  %p4342_p12 = pneg %p4321_p9  ;;  %s4333_s25 = int_to_ptr.vmem [resolvable:$true] %s557_s25 }
  0x25   : > { %s4330_s15 = scalar_lea.hbm %s5106_s4, %s4315_s19  ;;  %s3988_s29 = scalar_lea.hbm %s5106_s4, 512 }
  0x26   : > { %s3983_s17 = scalar_lea.hbm %s4330_s15, 256  ;;  %p3989_p1 = scmp.lt.u32.totalorder %s4330_s15, %s5106_s4 }
  0x27   : > { %p3984_p11 = scmp.ne.s32.totalorder %s4330_s15, %s3983_s17  ;;  %p3990_p2 = scmp.lt.u32.totalorder %s3988_s29, %s3983_s17 }
  0x28   : > { %p3992_p4 = scmp.lt.u32.totalorder %s3983_s17, %s4330_s15 }
  0x29   : > { %p3986_p13 = pnand %p4342_p12, %p3984_p11  ;;  %p3991_p3 = por %p3990_p2, %p3989_p1 }
  0x2b   : > { %p3987_p0 = pneg %p3986_p13  ;;  %p3993_p5 = por %p3992_p4, %p3991_p3 }
  0x2d   : > { %p3994_p6 = pnand %p3993_p5, %p3987_p0 }
  0x2f   : > { %3997 = shalt.err (!%p3994_p6)
}
  0x30   : > { %s3998_s30 = scalar_lea.vmem %s4333_s25, 256  ;;  %s4159_s16 = smov [#allocation5]  }
  0x31   : > { %p3999_p8 = scmp.ne.s32.totalorder %s4333_s25, %s3998_s30  ;;  %s4003_s28 = sshll.u32 %s4159_s16, 4  ;;  %s4004_s28 = int_to_ptr.vmem [resolvable:$false] %s4003_s28 }
  0x32   : > { %s4005_s1 = scalar_lea.vmem %s4004_s28, 512  ;;  %p4006_p10 = scmp.lt.s32.totalorder %s4333_s25, %s4004_s28 }
  0x33   : > { %p4001_p11 = pnand %p3999_p8, %p4342_p12  ;;  %p4007_p7 = scmp.lt.s32.totalorder %s4005_s1, %s3998_s30 }
  0x35   : > { %p4002_p13 = pneg %p4001_p11  ;;  %p4008_p1 = por %p4007_p7, %p4006_p10 }
  0x37   : > { %p4009_p2 = pnand %p4008_p1, %p4002_p13 }
  0x39   : > { %4012 = shalt.err (!%p4009_p2)
}
  0x3a   : > { %s5085_s13 = smov 64   ;;  %s5087_s17 = smov 4  }
  0x3b   : > { %3841 = dma.hbm_to_vmem [thread:$0]  (!%p4321_p9), %s4330_s15, 256, %s4333_s25, %s4336_s18, %s5085_s13, %s5085_s13, %s5087_s17  }
  0x3c   : > { %p636_p7 = scmp.lt.s32.totalorder %s4157_s26, 3  ;;  %p5108_p10 = scmp.ge.s32.totalorder %s4157_s26, 1 }
  0x3d   : > { %s5110_s2 = sld [smem:[#allocation18_spill]]  ;;  %s523_s1 = scalar_lea.vmem [#allocation2], %s4319_s20 }
  0x3e   : > { %p4372_p0 = pnand %p5108_p10, %p636_p7  ;;  %s530_s4 = sshll.u32 %s523_s1, 4  ;;  %s4383_s4 = int_to_ptr.vmem [resolvable:$true] %s530_s4 }
  0x3f   : > { %s5111_s15 = sand.u32 1, %s4145_s23  }
  0x40   : > { %s5109_s29 = scalar_select %p4372_p0, 1, 0 }
  0x41   : > { %s4387_s25 = scalar_lea.sflag [#allocation3], %s5111_s15 }
  0x43   : > { %s4380_s28 = scalar_lea.hbm %s5110_s2, %s4315_s19  ;;  %s4018_s16 = scalar_lea.hbm %s5110_s2, 512 }
  0x44   : > { %s4013_s13 = scalar_lea.hbm %s4380_s28, 256  ;;  %p4019_p6 = scmp.lt.u32.totalorder %s4380_s28, %s5110_s2 }
  0x45   : > { %p4014_p3 = scmp.ne.s32.totalorder %s4380_s28, %s4013_s13  ;;  %p4020_p8 = scmp.lt.u32.totalorder %s4018_s16, %s4013_s13 }
  0x46   : > { %p4022_p13 = scmp.lt.u32.totalorder %s4013_s13, %s4380_s28 }
  0x47   : > { %p4016_p4 = pnand %p4014_p3, %p4342_p12  ;;  %p4021_p11 = por %p4020_p8, %p4019_p6 }
  0x49   : > { %p4017_p5 = pneg %p4016_p4  ;;  %p4023_p1 = por %p4022_p13, %p4021_p11 }
  0x4b   : > { %p4024_p2 = pnand %p4023_p1, %p4017_p5 }
  0x4d   : > { %4027 = shalt.err (!%p4024_p2)
}
  0x4e   : > { %s4028_s1 = scalar_lea.vmem %s4383_s4, 256  ;;  %s4162_s17 = smov [#allocation2]  }
  0x4f   : > { %p4029_p7 = scmp.ne.s32.totalorder %s4383_s4, %s4028_s1  ;;  %s4033_s15 = sshll.u32 %s4162_s17, 4  ;;  %s4034_s15 = int_to_ptr.vmem [resolvable:$false] %s4033_s15 }
  0x50   : > { %s4035_s12 = scalar_lea.vmem %s4034_s15, 512  ;;  %p4036_p4 = scmp.lt.s32.totalorder %s4383_s4, %s4034_s15 }
  0x51   : > { %p4031_p10 = pnand %p4029_p7, %p4342_p12  ;;  %p4037_p0 = scmp.lt.s32.totalorder %s4035_s12, %s4028_s1 }
  0x53   : > { %p4032_p3 = pneg %p4031_p10  ;;  %p4038_p6 = por %p4037_p0, %p4036_p4 }
  0x55   : > { %p4039_p8 = pnand %p4038_p6, %p4032_p3 }
  0x57   : > { %4042 = shalt.err (!%p4039_p8)
}
  0x58   : > { %s5112_s26 = smov 4   ;;  %s5113_s13 = smov 64  }
  0x59   : > { %3838 = dma.hbm_to_vmem [thread:$0]  (!%p4321_p9), %s4380_s28, 256, %s4383_s4, %s4387_s25, %s5113_s13, %s5113_s13, %s5112_s26  }
  0x5a   : > { %s5114_s8 = sld [smem:[#allocation20_spill]]  ;;  %s589_s1 = scalar_lea.vmem [#allocation7], %s4319_s20 }
  0x5b   : > { %s596_s15 = sshll.u32 %s589_s1, 4  ;;  %s4421_s15 = int_to_ptr.vmem [resolvable:$true] %s596_s15 }
  0x60   : > { %s4418_s17 = scalar_lea.hbm %s5114_s8, %s4315_s19  ;;  %s4048_s28 = scalar_lea.hbm %s5114_s8, 512 }
  0x61   : > { %s4043_s12 = scalar_lea.hbm %s4418_s17, 256  ;;  %p4049_p13 = scmp.lt.u32.totalorder %s4418_s17, %s5114_s8 }
  0x62   : > { %p4044_p0 = scmp.ne.s32.totalorder %s4418_s17, %s4043_s12  ;;  %p4050_p1 = scmp.lt.u32.totalorder %s4048_s28, %s4043_s12 }
  0x63   : > { %p4052_p7 = scmp.lt.u32.totalorder %s4043_s12, %s4418_s17 }
  0x64   : > { %p4046_p5 = pnand %p4044_p0, %p4342_p12  ;;  %p4051_p2 = por %p4050_p1, %p4049_p13 }
  0x66   : > { %p4047_p11 = pneg %p4046_p5  ;;  %p4053_p10 = por %p4052_p7, %p4051_p2 }
  0x68   : > { %p4054_p3 = pnand %p4053_p10, %p4047_p11 }
  0x6a   : > { %4057 = shalt.err (!%p4054_p3)
}
  0x6b   : > { %s4058_s20 = scalar_lea.vmem %s4421_s15, 256  ;;  %s4163_s2 = smov [#allocation7]  }
  0x6c   : > { %p4059_p4 = scmp.ne.s32.totalorder %s4421_s15, %s4058_s20  ;;  %s4063_s30 = sshll.u32 %s4163_s2, 4  ;;  %s4064_s30 = int_to_ptr.vmem [resolvable:$false] %s4063_s30 }
  0x6d   : > { %s4065_s16 = scalar_lea.vmem %s4064_s30, 512  ;;  %p4066_p0 = scmp.lt.s32.totalorder %s4421_s15, %s4064_s30 }
  0x6e   : > { %p4061_p6 = pnand %p4059_p4, %p4342_p12  ;;  %p4067_p5 = scmp.lt.s32.totalorder %s4065_s16, %s4058_s20 }
  0x70   : > { %p4062_p8 = pneg %p4061_p6  ;;  %p4068_p13 = por %p4067_p5, %p4066_p0 }
  0x72   : > { %p4069_p1 = pnand %p4068_p13, %p4062_p8 }
  0x74   : > { %4072 = shalt.err (!%p4069_p1)
}
  0x75   : > { %3844 = dma.hbm_to_vmem [thread:$0]  (!%p4321_p9), %s4418_s17, 256, %s4421_s15, %s4336_s18, %s5113_s13, %s5113_s13, %s5112_s26  }
  0x76   : > { %p5115_p12 = scmp.ne.s32.totalorder %s5109_s29, 0 }
  0x77   : > { %s642_s14 = sand.u32 (!%p5115_p12), 1, %s4141_s22   ;;  %p5116_p11 = scmp.ne.s32.totalorder (!%p5115_p12), %s5103_s0, 0 }
  0x78   : > { %640 = sbr.rel (%p5115_p12) target bundleno = 3236 (0xca4), region = 84  ;;  %s4451_s1 = sshll.u32 (!%p5115_p12), %s642_s14, 4 }
  0x79   : > { %s643_s12 = scalar_lea.sflag (!%p5115_p12), [#allocation3], %s642_s14 }
  0x7f   : > { %4124 = dma.done.wait (%p5116_p11), %s643_s12, 256  }
  0x80   : > { %4126 = vsyncadd (%p5116_p11), %s643_s12, 4294967040  ;;  %s651_s18 = sand.u32 1, %s4292_s27  }
  0x81   : > { %s652_s21 = scalar_lea.sflag [#allocation6], %s651_s18 }
  0x82   : > { %4128 = dma.done.wait (%p5116_p11), %s652_s21, 512  }
  0x83   : > { %4130 = vsyncadd (%p5116_p11), %s652_s21, 4294966784  ;;  %p769_p9 = scmp.lt.s32.totalorder %s4149_s24, 1  ;;  %s5117_s2 = sld [smem:[#allocation21_spill]] }
  0x84   : > { %s5118_s14 = sld [smem:[#allocation22_spill]]  ;;  %s664_s12 = scalar_lea.vmem [#allocation7], %s4451_s1 }
  0x85   : > { %s4466_s26 = scalar_select %p769_p9, %s4149_s24, 1 }
  0x86   : > { %p3576_p2 = scmp.ne.s32.totalorder %s4149_s24, 0 }
  0x87   : > { %s783_s21 = scalar_lea.vmem %s5071_s9, %s4466_s26  ;;  %s3642_s13 = sshll.u32 %s4466_s26, 5  ;;  %vm806_vm0 = vcmask (!%p3576_p2), 261120  }
  0x88   : > { %s4492_s0 = scalar_lea.vmem %s5072_s10, %s3642_s13  ;;  %s791_s25 = scalar_lea.vmem %s5073_s11, %s4466_s26 }
  0x89   : > { %s794_s4 = scalar_lea.vmem %s5117_s2, %s4466_s26  ;;  %803 = sbr.rel (%p3576_p2) target bundleno = 146 (0x92), region = 100 }
  0x8a   : > { %s797_s8 = scalar_lea.vmem %s5118_s14, %s4466_s26  ;;  %s5119_s13 = sld [smem:[#allocation16_spill]] (!%p3576_p2) }
  0x90   : > { %v804_v0 = vld [vmem:[%s5119_s13] sm:$0xff]  ;;  %v805_v1 = vld [vmem:[%s5119_s13 + $0x8] sm:$0xff] }
  0x91   : > { %807 = vst.msk [vmem:[#allocation8] sm:$0xff] %vm806_vm0, %v804_v0  ;;  %808 = vst.msk [vmem:[#allocation8 + $0x8] sm:$0xff] %vm806_vm0, %v805_v1 }
  0x92 PF: > { %s5120_s2 = scalar_lea.vmem [#allocation2], %s4451_s1  ;;  %v4164_v3 = vmov 0.0   ;;  %vm4165_vm1 = vmmov 0   ;;  %vm835_vm2 = vcmask 261120   ;;  %s5122_s20 = scalar_lea.vmem %s5065_s3, %s4466_s26  ;;  %v4171_v23 = vmov 1983009808  }
  0x93   : > { %v3927_v2 = vld [vmem:[%s5120_s2] sm:$0xff]   ;;  %3693 = vmatprep.subr.bf16.mxu0 %v4164_v3  ;;  %3701 = vmatprep.subr.bf16.mxu1 %v4164_v3  ;;  %s5121_s14 = smov %s5120_s2  ;;  %s4166_s30 = smov 104   ;;  %v905_v24 = vunpack.c.l.s4 %v4171_v23  ;;  %v907_v25 = vlaneseq  ;;  %v4172_v26 = vmov 1934713408   ;;  %vm1804_vm3 = vcmask 64512  }
  0x94   : > { %3694 = vmatpush3.bf16.msra.mxu0 %v3927_v2  ;;  %v3928_v4 = vld [vmem:[%s5121_s14 + $0x8] sm:$0xff]   ;;  %3697 = vmatprep.mubr.msk.bf16.mxu0 %vm4165_vm1, %v4164_v3  ;;  %v3577_v8 = vld [vmem:[%s5122_s20] ss:$0 sm:$0xff]  ;;  %s4167_s16 = smov 120   ;;  %s4168_s18 = smov 112   ;;  %v937_v27 = vunpack.c.l.s4 %v4172_v26  ;;  %vm2284_vm4 = vcmask 1043456  }
  0x95   : > { %3695 = vmatprep.subr.bf16.mxu0 %v4164_v3  ;;  %3703 = vmatprep.mubr.msk.bf16.mxu1 %vm4165_vm1, %v4164_v3  ;;  %s4169_s29 = smov 96   ;;  %s4170_s17 = smov 64   ;;  %v906_v28 = vunpack.c.0.s8 %v905_v24  ;;  %v908_v29 = vshrl.u32 %v907_v25, 7  ;;  %vm2948_vm5 = vcmask 130048   ;;  %vm2951_vm6 = vcmask 195584  }
  0x96   : > { %v938_v32 = vunpack.c.0.s8 %v937_v27  ;;  %s5123_s14 = sld [smem:[#allocation17_spill]]  ;;  %s5124_s28 = scalar_lea.vmem [#allocation5], %s4451_s1  ;;  %vm3179_vm7 = vcmask 523264  }
  0x97   : > { %v4574_v33 = vsub.s32 %v906_v28, %v908_v29  ;;  %s5125_s19 = smov %s5124_s28  ;;  %s4173_s20 = smov 16  }
  0x98   : > { %v809_v5 = vld [vmem:[#allocation8] sm:$0xff]  ;;  %v810_v6 = vld [vmem:[#allocation8 + $0x8] sm:$0xff]  ;;  %3696 = vmatpush3.bf16.msra.mxu0 %v3928_v4  ;;  %v4576_v40 = vsub.s32 %v938_v32, %v908_v29  ;;  %s5127_s15 = scalar_lea.vmem %s5068_s6, %s4466_s26  ;;  %p3631_p7 = scmp.eq.s32.totalorder %s4149_s24, 1 }
  0x99   : > { %v811_v7 = vpack.c.bf16 %v810_v6, %v809_v5  ;;  %3707 = vmatprep.subr.bf16.mxu0 %v4164_v3 }
  0x9b   : > { %3698 = vmatmul.mubr.msk.bf16.vlgmr.msra.gmra.mrb[0].mxu0 %vm835_vm2, %v811_v7 }
  0x9c   : > { %3709 = vmatprep.mubr.msk.bf16.mxu0 %vm4165_vm1, %v4164_v3 }
 0x16e   : > { %v873_v9 = vpop.f32.mrb[0].mxu0 }
 0x16f   : > { %v874_v10 = vadd.f32 %v3577_v8, %v873_v9  ;;  %v3699_v11 = vpop.f32.mrb[1].mxu0 }
 0x170   : > { %v876_v12 = vpop.f32.mrb[2].mxu0 }
 0x171   : > { %1192 = vrot.lane.b32.xlu1 %v874_v10, %s4166_s30  ;;  %1184 = vrot.lane.b32.xlu0 %v874_v10, %s4167_s16  ;;  %v3700_v13 = vpop.f32.mrb[3].mxu0  ;;  %v4535_v14 = vadd.f32 %v3577_v8, %v876_v12  ;;  %v4550_v18 = vmul.f32 0.35355338, %v874_v10 }
 0x173   : > { %v4564_v21 = vmul.f32 0.35355338, %v4535_v14 }
 0x175   : > { %1188 = vrot.lane.b32.xlu0 %v874_v10, %s4168_s18  ;;  %1186 = vrot.lane.b32.xlu1 %v4535_v14, %s4167_s16 }
 0x179   : > { %1190 = vrot.lane.b32.xlu0 %v4535_v14, %s4168_s18  ;;  %1194 = vrot.lane.b32.xlu1 %v4535_v14, %s4166_s30 }
 0x17d   : > { %1196 = vrot.lane.b32.xlu0 %v874_v10, %s4169_s29 }
 0x1e3   : > { %v4541_v15 = vpop.permute.xlu0 %1184  ;;  %v4544_v16 = vpop.permute.xlu1 %1192 }
 0x1e4   : > { %1200 = vrot.lane.b32.xlu1 %v4541_v15, %s4169_s29 }
 0x1e7   : > { %v4546_v17 = vpop.permute.xlu0 %1188  ;;  %v4557_v19 = vpop.permute.xlu1 %1186 }
 0x1e8   : > { %1204 = vrot.lane.b32.xlu0 %v4546_v17, %s4169_s29  ;;  %1208 = vrot.lane.b32.xlu1 %v4544_v16, %s4169_s29 }
 0x1eb   : > { %v4559_v20 = vpop.permute.xlu0 %1190  ;;  %v4566_v22 = vpop.permute.xlu1 %1194 }
 0x1ec   : > { %884 = vrot.lane.b32.xlu0 %v4550_v18, %s4167_s16  ;;  %890 = vrot.lane.b32.xlu1 %v4550_v18, %s4168_s18 }
 0x1ef   : > { %v1197_v30 = vpop.permute.xlu0 %1196 }
 0x1f0   : > { %896 = vrot.lane.b32.xlu0 %v4550_v18, %s4166_s30  ;;  %1198 = vrot.lane.b32.xlu1 %v4535_v14, %s4169_s29 }
 0x1f4   : > { %1206 = vrot.lane.b32.xlu1 %v4559_v20, %s4169_s29  ;;  %1202 = vrot.lane.b32.xlu0 %v4557_v19, %s4169_s29 }
 0x1f8   : > { %1210 = vrot.lane.b32.xlu0 %v4566_v22, %s4169_s29  ;;  %886 = vrot.lane.b32.xlu1 %v4564_v21, %s4167_s16  ;;  %s4175_s16 = smov 24  }
 0x1fc   : > { %892 = vrot.lane.b32.xlu0 %v4564_v21, %s4168_s18  ;;  %898 = vrot.lane.b32.xlu1 %v4564_v21, %s4166_s30  ;;  %s4174_s30 = smov 8  }
 0x200   : > { %1500 = vrot.lane.b32.xlu1 %v874_v10, %s4170_s17 }
 0x256   : > { %v1201_v31 = vpop.permute.xlu1 %1200 }
 0x25a   : > { %v1205_v34 = vpop.permute.xlu0 %1204  ;;  %v1209_v35 = vpop.permute.xlu1 %1208 }
 0x25b   : > { %v1220_v36 = vcombine.low %v1197_v30, %v1205_v34  ;;  %v1221_v37 = vcombine.high %v1197_v30, %v1205_v34  ;;  %v1236_v38 = vcombine.low %v1201_v31, %v1209_v35  ;;  %v1237_v39 = vcombine.high %v1201_v31, %v1209_v35 }
 0x25d   : > { %v1228_v41 = vrot.slane %v1220_v36, %v4574_v33  ;;  %v1235_v42 = vrot.slane %v1221_v37, %v4574_v33  ;;  %v1244_v43 = vrot.slane %v1236_v38, %v4574_v33  ;;  %v1251_v44 = vrot.slane %v1237_v39, %v4574_v33 }
 0x25e   : > { %v885_v45 = vpop.permute.xlu0 %884  ;;  %v891_v46 = vpop.permute.xlu1 %890 }
 0x25f   : > { %v1252_v47 = vcombine.low %v1228_v41, %v1244_v43  ;;  %v1253_v48 = vcombine.high %v1228_v41, %v1244_v43  ;;  %v1268_v49 = vcombine.low %v1235_v42, %v1251_v44  ;;  %v1269_v50 = vcombine.high %v1235_v42, %v1251_v44 }
 0x260   : > { %v902_v55 = vcombine.low %v4550_v18, %v891_v46  ;;  %v903_v56 = vcombine.high %v4550_v18, %v891_v46 }
 0x261   : > { %v1260_v51 = vrot.slane %v1252_v47, %v4576_v40  ;;  %v1267_v52 = vrot.slane %v1253_v48, %v4576_v40  ;;  %v1276_v53 = vrot.slane %v1268_v49, %v4576_v40  ;;  %v1283_v54 = vrot.slane %v1269_v50, %v4576_v40 }
 0x262   : > { %v897_v57 = vpop.permute.xlu0 %896  ;;  %v1199_v58 = vpop.permute.xlu1 %1198  ;;  %v910_v6 = vrot.slane %v902_v55, %v4574_v33  ;;  %v917_v7 = vrot.slane %v903_v56, %v4574_v33 }
 0x263   : > { %v1356_v59 = vcombine.low %v1260_v51, %v1267_v52  ;;  %v3585_v60 = vcombine.high %v1260_v51, %v1267_v52  ;;  %v1372_v61 = vcombine.low %v1276_v53, %v1283_v54  ;;  %v3586_v62 = vcombine.high %v1276_v53, %v1283_v54 }
 0x264   : > { %v918_v63 = vcombine.low %v885_v45, %v897_v57  ;;  %v919_v0 = vcombine.high %v885_v45, %v897_v57 }
 0x265   : > { %v4589_v1 = vrot.slane %v1356_v59, %v4574_v33  ;;  %v4592_v2 = vrot.slane %v3585_v60, %v4574_v33  ;;  %v4595_v4 = vrot.slane %v1372_v61, %v4574_v33  ;;  %v4598_v5 = vrot.slane %v3586_v62, %v4574_v33 }
 0x266   : > { %v926_v8 = vrot.slane %v918_v63, %v4574_v33  ;;  %v933_v9 = vrot.slane %v919_v0, %v4574_v33  ;;  %v1203_v10 = vpop.permute.xlu0 %1202  ;;  %v1207_v11 = vpop.permute.xlu1 %1206 }
 0x267   : > { %v1388_v12 = vcombine.low %v4589_v1, %v4592_v2  ;;  %v1404_v13 = vcombine.low %v4595_v4, %v4598_v5  ;;  %v1288_v26 = vcombine.low %v1199_v58, %v1207_v11  ;;  %v1289_v27 = vcombine.high %v1199_v58, %v1207_v11 }
 0x268   : > { %v934_v18 = vcombine.low %v910_v6, %v926_v8  ;;  %v935_v23 = vcombine.high %v910_v6, %v926_v8  ;;  %v950_v24 = vcombine.low %v917_v7, %v933_v9  ;;  %v951_v25 = vcombine.high %v917_v7, %v933_v9 }
 0x269   : > { %v1396_v28 = vrot.slane %v1388_v12, %v4576_v40  ;;  %v1412_v29 = vrot.slane %v1404_v13, %v4576_v40  ;;  %v1296_v46 = vrot.slane %v1288_v26, %v4574_v33  ;;  %v1303_v47 = vrot.slane %v1289_v27, %v4574_v33 }
 0x26a   : > { %v942_v30 = vrot.slane %v934_v18, %v4576_v40  ;;  %v949_v31 = vrot.slane %v935_v23, %v4576_v40  ;;  %v958_v32 = vrot.slane %v950_v24, %v4576_v40  ;;  %v965_v34 = vrot.slane %v951_v25, %v4576_v40  ;;  %v1211_v35 = vpop.permute.xlu0 %1210  ;;  %v887_v36 = vpop.permute.xlu1 %886 }
 0x26b   : > { %v1304_v37 = vcombine.low %v1203_v10, %v1211_v35  ;;  %v1305_v38 = vcombine.high %v1203_v10, %v1211_v35  ;;  %v1420_v39 = vcombine.low %v1396_v28, %v1412_v29  ;;  %v1421_v41 = vcombine.high %v1396_v28, %v1412_v29 }
 0x26c   : > { %v1038_v42 = vcombine.low %v942_v30, %v949_v31  ;;  %v3581_v43 = vcombine.high %v942_v30, %v949_v31  ;;  %v1054_v44 = vcombine.low %v958_v32, %v965_v34  ;;  %v3582_v45 = vcombine.high %v958_v32, %v965_v34 }
 0x26d   : > { %v1312_v48 = vrot.slane %v1304_v37, %v4574_v33  ;;  %v1319_v49 = vrot.slane %v1305_v38, %v4574_v33  ;;  %v1492_v62 = vpack.c.bf16 %v1420_v39, %v1420_v39  ;;  %v1493_v63 = vpack.c.bf16 %v1421_v41, %v1421_v41 }
 0x26e   : > { %v4619_v50 = vrot.slane %v1038_v42, %v4574_v33  ;;  %v4622_v51 = vrot.slane %v3581_v43, %v4574_v33  ;;  %v4625_v52 = vrot.slane %v1054_v44, %v4574_v33  ;;  %v4628_v53 = vrot.slane %v3582_v45, %v4574_v33  ;;  %v893_v54 = vpop.permute.xlu0 %892  ;;  %v899_v59 = vpop.permute.xlu1 %898 }
 0x26f   : > { %v1320_v55 = vcombine.low %v1296_v46, %v1312_v48  ;;  %v1321_v56 = vcombine.high %v1296_v46, %v1312_v48  ;;  %v1336_v57 = vcombine.low %v1303_v47, %v1319_v49  ;;  %v1337_v58 = vcombine.high %v1303_v47, %v1319_v49 }
 0x270   : > { %v970_v60 = vcombine.low %v4564_v21, %v893_v54  ;;  %v971_v61 = vcombine.high %v4564_v21, %v893_v54  ;;  %v986_v11 = vcombine.low %v887_v36, %v899_v59  ;;  %v987_v12 = vcombine.high %v887_v36, %v899_v59 }
 0x271   : > { %v1328_v0 = vrot.slane %v1320_v55, %v4576_v40  ;;  %v1335_v6 = vrot.slane %v1321_v56, %v4576_v40  ;;  %v1344_v7 = vrot.slane %v1336_v57, %v4576_v40  ;;  %v1351_v8 = vrot.slane %v1337_v58, %v4576_v40 }
 0x272   : > { %v978_v9 = vrot.slane %v970_v60, %v4574_v33  ;;  %v985_v10 = vrot.slane %v971_v61, %v4574_v33  ;;  %v1071_v13 = vcombine.high %v4619_v50, %v4622_v51  ;;  %v1087_v21 = vcombine.high %v4625_v52, %v4628_v53 }
 0x273   : > { %v1424_v18 = vcombine.low %v1328_v0, %v1335_v6  ;;  %v994_v23 = vrot.slane %v986_v11, %v4574_v33  ;;  %v1001_v24 = vrot.slane %v987_v12, %v4574_v33  ;;  %v1809_v25 = vsel %vm1804_vm3, %v1492_v62, 0 }
 0x274   : > { %v1855_v26 = vsel %vm1804_vm3, %v1493_v63, 0  ;;  %v3587_v28 = vcombine.high %v1328_v0, %v1335_v6  ;;  %v1440_v29 = vcombine.low %v1344_v7, %v1351_v8  ;;  %v3588_v30 = vcombine.high %v1344_v7, %v1351_v8  ;;  %3702 = vmatpush3.bf16.xpose.msra.mxu1 %v1809_v25 }
 0x275   : > { %v4647_v27 = vrot.slane %v1424_v18, %v4574_v33  ;;  %v1002_v31 = vcombine.low %v978_v9, %v994_v23  ;;  %v1003_v32 = vcombine.high %v978_v9, %v994_v23  ;;  %v1018_v34 = vcombine.low %v985_v10, %v1001_v24  ;;  %3708 = vmatpush3.bf16.xpose.msra.mxu0 %v1855_v26 }
 0x276   : > { %v1019_v35 = vcombine.high %v985_v10, %v1001_v24  ;;  %v1070_v36 = vcombine.low %v4619_v50, %v4622_v51  ;;  %v1086_v37 = vcombine.low %v4625_v52, %v4628_v53  ;;  %3713 = vmatprep.subr.bf16.mxu1 %v4164_v3  ;;  %3719 = vmatprep.subr.bf16.mxu0 %v4164_v3 }
 0x277   : > { %v1389_v38 = vcombine.high %v4589_v1, %v4592_v2  ;;  %v1010_v39 = vrot.slane %v1002_v31, %v4576_v40  ;;  %v1017_v41 = vrot.slane %v1003_v32, %v4576_v40  ;;  %v1026_v42 = vrot.slane %v1018_v34, %v4576_v40 }
 0x278   : > { %v1033_v43 = vrot.slane %v1019_v35, %v4576_v40  ;;  %v1078_v44 = vrot.slane %v1070_v36, %v4576_v40  ;;  %v1094_v45 = vrot.slane %v1086_v37, %v4576_v40  ;;  %v1405_v47 = vcombine.high %v4595_v4, %v4598_v5 }
 0x279   : > { %v1403_v46 = vrot.slane %v1389_v38, %v4576_v40  ;;  %v1106_v48 = vcombine.low %v1010_v39, %v1017_v41  ;;  %v3583_v49 = vcombine.high %v1010_v39, %v1017_v41  ;;  %v1439_v50 = vrot.slane %v3587_v28, %v4574_v33 }
 0x27a   : > { %v1122_v1 = vcombine.low %v1026_v42, %v1033_v43  ;;  %v3584_v2 = vcombine.high %v1026_v42, %v1033_v43  ;;  %v1102_v51 = vcombine.low %v1078_v44, %v1094_v45  ;;  %v1103_v52 = vcombine.high %v1078_v44, %v1094_v45 }
 0x27b   : > { %v1419_v53 = vrot.slane %v1405_v47, %v4576_v40  ;;  %v1447_v54 = vrot.slane %v1440_v29, %v4574_v33  ;;  %v1455_v55 = vrot.slane %v3588_v30, %v4574_v33  ;;  %v4671_v56 = vrot.slane %v1106_v48, %v4574_v33 }
 0x27c   : > { %v1121_v57 = vrot.slane %v3583_v49, %v4574_v33  ;;  %v1174_v4 = vpack.c.bf16 %v1102_v51, %v1102_v51  ;;  %v1175_v5 = vpack.c.bf16 %v1103_v52, %v1103_v52  ;;  %v1129_v60 = vrot.slane %v1122_v1, %v4574_v33 }
 0x27d   : > { %v1422_v58 = vcombine.low %v1403_v46, %v1419_v53  ;;  %v1423_v59 = vcombine.high %v1403_v46, %v1419_v53  ;;  %v1137_v61 = vrot.slane %v3584_v2, %v4574_v33  ;;  %v1085_v62 = vrot.slane %v1071_v13, %v4576_v40 }
 0x27e   : > { %3704 = vmatmul.mubr.msk.bf16.vlgmr.msra.gmra.mrb[0].mxu1 %vm1804_vm3, %v1174_v4  ;;  %3710 = vmatmul.mubr.msk.bf16.vlgmr.msra.gmra.mrb[4].mxu0 %vm1804_vm3, %v1175_v5  ;;  %v1101_v6 = vrot.slane %v1087_v21, %v4576_v40  ;;  %v1456_v7 = vcombine.low %v4647_v27, %v1439_v50  ;;  %v1472_v8 = vcombine.low %v1447_v54, %v1455_v55 }
 0x27f   : > { %v1494_v63 = vpack.c.bf16 %v1422_v58, %v1422_v58  ;;  %v1495_v0 = vpack.c.bf16 %v1423_v59, %v1423_v59  ;;  %3715 = vmatprep.mubr.msk.bf16.mxu1 %vm4165_vm1, %v4164_v3  ;;  %3721 = vmatprep.mubr.msk.bf16.mxu0 %vm4165_vm1, %v4164_v3  ;;  %v1138_v9 = vcombine.low %v4671_v56, %v1121_v57 }
 0x280   : > { %v1154_v12 = vcombine.low %v1129_v60, %v1137_v61  ;;  %v1464_v13 = vrot.slane %v1456_v7, %v4576_v40  ;;  %v1480_v21 = vrot.slane %v1472_v8, %v4576_v40  ;;  %v1104_v18 = vcombine.low %v1085_v62, %v1101_v6 }
 0x281   : > { %v1901_v10 = vsel %vm1804_vm3, %v1494_v63, 0  ;;  %v1947_v11 = vsel %vm1804_vm3, %v1495_v0, 0  ;;  %v1105_v23 = vcombine.high %v1085_v62, %v1101_v6  ;;  %v1457_v24 = vcombine.high %v4647_v27, %v1439_v50 }
 0x282   : > { %3714 = vmatpush3.bf16.xpose.msra.mxu1 %v1901_v10  ;;  %3720 = vmatpush3.bf16.xpose.msra.mxu0 %v1947_v11  ;;  %v1488_v25 = vcombine.low %v1464_v13, %v1480_v21  ;;  %v1489_v26 = vcombine.high %v1464_v13, %v1480_v21  ;;  %v1473_v29 = vcombine.high %v1447_v54, %v1455_v55 }
 0x283   : > { %3725 = vmatprep.subr.bf16.mxu1 %v4164_v3  ;;  %3731 = vmatprep.subr.bf16.mxu0 %v4164_v3  ;;  %v1471_v28 = vrot.slane %v1457_v24, %v4576_v40  ;;  %v1146_v32 = vrot.slane %v1138_v9, %v4576_v40  ;;  %v1176_v34 = vpack.c.bf16 %v1104_v18, %v1104_v18 }
 0x284   : > { %v1496_v30 = vpack.c.bf16 %v1488_v25, %v1488_v25  ;;  %v1497_v31 = vpack.c.bf16 %v1489_v26, %v1489_v26  ;;  %v1177_v35 = vpack.c.bf16 %v1105_v23, %v1105_v23  ;;  %v1162_v36 = vrot.slane %v1154_v12, %v4576_v40 }
 0x285   : > { %v1487_v37 = vrot.slane %v1473_v29, %v4576_v40  ;;  %v1139_v42 = vcombine.high %v4671_v56, %v1121_v57  ;;  %v1155_v43 = vcombine.high %v1129_v60, %v1137_v61  ;;  %v3644_v56 = vld [vmem:[%s5123_s14] sm:$0xff]  }
 0x286   : > { %v1993_v38 = vsel %vm1804_vm3, %v1496_v30, 0  ;;  %v2039_v39 = vsel %vm1804_vm3, %v1497_v31, 0  ;;  %v1170_v44 = vcombine.low %v1146_v32, %v1162_v36  ;;  %v1171_v45 = vcombine.high %v1146_v32, %v1162_v36 }
 0x287   : > { %v1490_v27 = vcombine.low %v1471_v28, %v1487_v37  ;;  %v1491_v41 = vcombine.high %v1471_v28, %v1487_v37  ;;  %v1153_v1 = vrot.slane %v1139_v42, %v4576_v40  ;;  %v1169_v2 = vrot.slane %v1155_v43, %v4576_v40 }
 0x288   : > { %v1178_v48 = vpack.c.bf16 %v1170_v44, %v1170_v44  ;;  %v1179_v49 = vpack.c.bf16 %v1171_v45, %v1171_v45  ;;  %v3645_v57 = vunpack.c.l.bf16 %v3644_v56  ;;  %v3646_v28 = vunpack.c.h.bf16 %v3644_v56 }
 0x289   : > { %3716 = vmatmul.mubr.msk.bf16.vlgmr.msra.gmra.mrb[4].mxu1 %vm1804_vm3, %v1176_v34  ;;  %3722 = vmatmul.mubr.msk.bf16.vlgmr.msra.gmra.mrb[8].mxu0 %vm1804_vm3, %v1177_v35  ;;  %v1498_v46 = vpack.c.bf16 %v1490_v27, %v1490_v27  ;;  %v1499_v47 = vpack.c.bf16 %v1491_v41, %v1491_v41  ;;  %v1172_v52 = vcombine.low %v1153_v1, %v1169_v2 }
 0x28a   : > { %3726 = vmatpush3.bf16.xpose.msra.mxu1 %v1993_v38  ;;  %3732 = vmatpush3.bf16.xpose.msra.mxu0 %v2039_v39  ;;  %v1173_v53 = vcombine.high %v1153_v1, %v1169_v2 }
 0x28b   : > { %3727 = vmatprep.mubr.msk.bf16.mxu1 %vm4165_vm1, %v4164_v3  ;;  %3733 = vmatprep.mubr.msk.bf16.mxu0 %vm4165_vm1, %v4164_v3  ;;  %v2085_v50 = vsel %vm1804_vm3, %v1498_v46, 0  ;;  %v2131_v51 = vsel %vm1804_vm3, %v1499_v47, 0  ;;  %v1180_v54 = vpack.c.bf16 %v1172_v52, %v1172_v52 }
 0x28c   : > { %3737 = vmatprep.subr.bf16.mxu1 %v4164_v3  ;;  %3743 = vmatprep.subr.bf16.mxu0 %v4164_v3  ;;  %v1181_v55 = vpack.c.bf16 %v1173_v53, %v1173_v53  ;;  %v1501_v53 = vpop.permute.xlu1 %1500 }
 0x291   : > { %3728 = vmatmul.mubr.msk.bf16.vlgmr.msra.gmra.mrb[8].mxu1 %vm1804_vm3, %v1178_v48  ;;  %3734 = vmatmul.mubr.msk.bf16.vlgmr.msra.gmra.mrb[12].mxu0 %vm1804_vm3, %v1179_v49 }
 0x292   : > { %3738 = vmatpush3.bf16.xpose.msra.mxu1 %v2085_v50  ;;  %3744 = vmatpush3.bf16.xpose.msra.mxu0 %v2131_v51 }
 0x293   : > { %3739 = vmatprep.mubr.msk.bf16.mxu1 %vm4165_vm1, %v4164_v3  ;;  %3745 = vmatprep.mubr.msk.bf16.mxu0 %vm4165_vm1, %v4164_v3 }
 0x294   : > { %3749 = vmatprep.subr.bf16.mxu1 %v4164_v3  ;;  %3755 = vmatprep.subr.bf16.mxu0 %v4164_v3 }
 0x299   : > { %3740 = vmatmul.mubr.msk.bf16.vlgmr.msra.gmra.mrb[12].mxu1 %vm1804_vm3, %v1180_v54  ;;  %3746 = vmatmul.mubr.msk.bf16.vlgmr.msra.gmra.mrb[16].mxu0 %vm1804_vm3, %v1181_v55 }
 0x29a   : > { %3751 = vmatprep.mubr.msk.bf16.mxu1 %vm4165_vm1, %v4164_v3  ;;  %3757 = vmatprep.mubr.msk.bf16.mxu0 %vm4165_vm1, %v4164_v3 }
 0x351   : > { %v1845_v4 = vpop.f32.mrb[0].mxu1  ;;  %v1891_v5 = vpop.f32.mrb[4].mxu0 }
 0x352   : > { %v4729_v58 = vadd.f32 %v3645_v57, %v1845_v4  ;;  %v4731_v59 = vadd.f32 %v3645_v57, %v1891_v5  ;;  %v3705_v60 = vpop.f32.mrb[1].mxu1  ;;  %v3711_v61 = vpop.f32.mrb[5].mxu0 }
 0x353   : > { %v1848_v62 = vpop.f32.mrb[2].mxu1  ;;  %v1894_v63 = vpop.f32.mrb[6].mxu0 }
 0x354   : > { %v3706_v0 = vpop.f32.mrb[3].mxu1  ;;  %v3712_v6 = vpop.f32.mrb[7].mxu0  ;;  %v2185_v7 = vsel %vm1804_vm3, %v4729_v58, -inf  ;;  %v2188_v8 = vsel %vm1804_vm3, %v4731_v59, -inf }
 0x355   : > { %2186 = vmax.xlane.f32.xlu0 %v2185_v7  ;;  %2189 = vmax.xlane.f32.xlu1 %v2188_v8 }
 0x35c   : > { %v1937_v9 = vpop.f32.mrb[4].mxu1  ;;  %v1983_v10 = vpop.f32.mrb[8].mxu0 }
 0x35d   : > { %v2179_v11 = vadd.f32 %v3645_v57, %v1937_v9  ;;  %v3717_v12 = vpop.f32.mrb[5].mxu1  ;;  %v3723_v13 = vpop.f32.mrb[9].mxu0  ;;  %v2180_v23 = vadd.f32 %v3645_v57, %v1983_v10 }
 0x35e   : > { %v1940_v21 = vpop.f32.mrb[6].mxu1  ;;  %v1986_v18 = vpop.f32.mrb[10].mxu0 }
 0x35f   : > { %v3718_v24 = vpop.f32.mrb[7].mxu1  ;;  %v3724_v25 = vpop.f32.mrb[11].mxu0  ;;  %v2191_v26 = vsel %vm1804_vm3, %v2179_v11, -inf  ;;  %v2194_v29 = vsel %vm1804_vm3, %v2180_v23, -inf }
 0x360   : > { %2192 = vmax.xlane.f32.xlu0 %v2191_v26 }
 0x364   : > { %v2029_v30 = vpop.f32.mrb[8].mxu1  ;;  %2195 = vmax.xlane.f32.xlu0 %v2194_v29  ;;  %v2075_v31 = vpop.f32.mrb[12].mxu0 }
 0x365   : > { %v2181_v32 = vadd.f32 %v3646_v28, %v2029_v30  ;;  %v2182_v34 = vadd.f32 %v3646_v28, %v2075_v31  ;;  %v3729_v35 = vpop.f32.mrb[9].mxu1  ;;  %v3735_v36 = vpop.f32.mrb[13].mxu0 }
 0x366   : > { %v2032_v37 = vpop.f32.mrb[10].mxu1  ;;  %v2078_v38 = vpop.f32.mrb[14].mxu0 }
 0x367   : > { %v3730_v39 = vpop.f32.mrb[11].mxu1  ;;  %v3736_v27 = vpop.f32.mrb[15].mxu0  ;;  %v2197_v41 = vsel %vm1804_vm3, %v2181_v32, -inf  ;;  %v2200_v42 = vsel %vm1804_vm3, %v2182_v34, -inf }
 0x368   : > { %2198 = vmax.xlane.f32.xlu1 %v2197_v41  ;;  %2201 = vmax.xlane.f32.xlu0 %v2200_v42 }
 0x36c   : > { %v2121_v43 = vpop.f32.mrb[12].mxu1  ;;  %v2167_v44 = vpop.f32.mrb[16].mxu0 }
 0x36d   : > { %v4741_v45 = vadd.f32 %v3646_v28, %v2121_v43  ;;  %v4743_v46 = vadd.f32 %v3646_v28, %v2167_v44  ;;  %v3741_v47 = vpop.f32.mrb[13].mxu1  ;;  %v3747_v48 = vpop.f32.mrb[17].mxu0 }
 0x36e   : > { %v2124_v49 = vpop.f32.mrb[14].mxu1  ;;  %v2170_v1 = vpop.f32.mrb[18].mxu0 }
 0x36f   : > { %v3742_v2 = vpop.f32.mrb[15].mxu1  ;;  %v3748_v50 = vpop.f32.mrb[19].mxu0  ;;  %v2203_v51 = vsel %vm1804_vm3, %v4741_v45, -inf  ;;  %v2206_v52 = vsel %vm1804_vm3, %v4743_v46, -inf }
 0x370   : > { %2204 = vmax.xlane.f32.xlu1 %v2203_v51  ;;  %2207 = vmax.xlane.f32.xlu0 %v2206_v52 }
 0x381   : > { %1508 = vrot.lane.b32.xlu1 %v4546_v17, %s4170_s17 }
 0x385   : > { %1512 = vrot.lane.b32.xlu1 %v4544_v16, %s4170_s17 }
 0x386   : > { %1504 = vrot.lane.b32.xlu0 %v4541_v15, %s4170_s17 }
 0x389   : > { %1502 = vrot.lane.b32.xlu1 %v4535_v14, %s4170_s17 }
 0x3e2   : > { %v2187_v54 = vpop.xlane.xlu0 %2186  ;;  %v2190_v55 = vpop.xlane.xlu1 %2189 }
 0x3e3   : > { %v2209_v56 = vsub.f32 %v4729_v58, %v2187_v54  ;;  %v2210_v57 = vsub.f32 %v4731_v59, %v2190_v55 }
 0x3e5   : > { %v2217_v4 = vmul.f32 1.442695, %v2209_v56  ;;  %v2219_v5 = vmul.f32 1.442695, %v2210_v57 }
 0x3e7   : > { %3937 = vpow2.f32 %v2217_v4 }
 0x3e8   : > { %3939 = vpow2.f32 %v2219_v5 }
 0x3ed   : > { %v2193_v17 = vpop.xlane.xlu0 %2192 }
 0x3ee   : > { %v2211_v60 = vsub.f32 %v2179_v11, %v2193_v17 }
 0x3f0   : > { %v2221_v16 = vmul.f32 1.442695, %v2211_v60 }
 0x3f1   : > { %v2196_v61 = vpop.xlane.xlu0 %2195  ;;  %v4759_v62 = vpop.eup %3937 }
 0x3f2   : > { %3941 = vpow2.f32 %v2221_v16  ;;  %v2212_v15 = vsub.f32 %v2180_v23, %v2196_v61  ;;  %v4761_v14 = vpop.eup %3939  ;;  %v2233_v63 = vsel %vm1804_vm3, %v4759_v62, 0.0 }
 0x3f3   : > { %2234 = vadd.xlane.f32.xlu1 %v2233_v63  ;;  %v2236_v59 = vsel %vm1804_vm3, %v4761_v14, 0.0 }
 0x3f4   : > { %v2223_v58 = vmul.f32 1.442695, %v2212_v15  ;;  %2237 = vadd.xlane.f32.xlu0 %v2236_v59 }
 0x3f5   : > { %v2199_v0 = vpop.xlane.xlu1 %2198  ;;  %v2202_v6 = vpop.xlane.xlu0 %2201 }
 0x3f6   : > { %3943 = vpow2.f32 %v2223_v58  ;;  %v2213_v7 = vsub.f32 %v2181_v32, %v2199_v0  ;;  %v2214_v8 = vsub.f32 %v2182_v34, %v2202_v6 }
 0x3f8   : > { %v2225_v9 = vmul.f32 1.442695, %v2213_v7  ;;  %v2227_v10 = vmul.f32 1.442695, %v2214_v8 }
 0x3fa   : > { %3945 = vpow2.f32 %v2225_v9 }
 0x3fb   : > { %3947 = vpow2.f32 %v2227_v10 }
 0x3fc   : > { %v4767_v11 = vpop.eup %3941 }
 0x3fd   : > { %v4769_v12 = vpop.xlane.xlu1 %2204  ;;  %v2239_v13 = vsel %vm1804_vm3, %v4767_v11, 0.0  ;;  %v4773_v21 = vpop.xlane.xlu0 %2207 }
 0x3fe   : > { %2240 = vadd.xlane.f32.xlu0 %v2239_v13  ;;  %v2216_v9 = vsub.f32 %v4743_v46, %v4773_v21 }
 0x400   : > { %v4775_v18 = vpop.eup %3943  ;;  %v2231_v10 = vmul.f32 1.442695, %v2216_v9 }
 0x401   : > { %v1509_v23 = vpop.permute.xlu1 %1508  ;;  %v2242_v24 = vsel %vm1804_vm3, %v4775_v18, 0.0  ;;  %v1505_v29 = vpop.permute.xlu0 %1504 }
 0x402   : > { %2243 = vadd.xlane.f32.xlu1 %v2242_v24  ;;  %v1524_v26 = vcombine.low %v1501_v53, %v1509_v23  ;;  %v1525_v28 = vcombine.high %v1501_v53, %v1509_v23  ;;  %3949 = vpow2.f32 %v2231_v10 }
 0x404   : > { %v4779_v25 = vpop.eup %3945  ;;  %v1532_v36 = vrot.slane %v1524_v26, %v4574_v33  ;;  %v1539_v37 = vrot.slane %v1525_v28, %v4574_v33 }
 0x405   : > { %v1513_v30 = vpop.permute.xlu1 %1512  ;;  %v2245_v31 = vsel %vm1804_vm3, %v4779_v25, 0.0  ;;  %v4783_v32 = vpop.eup %3947 }
 0x406   : > { %v1540_v34 = vcombine.low %v1505_v29, %v1513_v30  ;;  %v1541_v35 = vcombine.high %v1505_v29, %v1513_v30  ;;  %2246 = vadd.xlane.f32.xlu0 %v2245_v31  ;;  %v2248_v27 = vsel %vm1804_vm3, %v4783_v32, 0.0 }
 0x408   : > { %v1548_v38 = vrot.slane %v1540_v34, %v4574_v33  ;;  %v1555_v39 = vrot.slane %v1541_v35, %v4574_v33 }
 0x409   : > { %v1503_v46 = vpop.permute.xlu1 %1502 }
 0x40a   : > { %v1556_v41 = vcombine.low %v1532_v36, %v1548_v38  ;;  %v1557_v42 = vcombine.high %v1532_v36, %v1548_v38  ;;  %v1572_v43 = vcombine.low %v1539_v37, %v1555_v39  ;;  %v1573_v44 = vcombine.high %v1539_v37, %v1555_v39  ;;  %2249 = vadd.xlane.f32.xlu0 %v2248_v27 }
 0x40c   : > { %v1564_v47 = vrot.slane %v1556_v41, %v4576_v40  ;;  %v1571_v48 = vrot.slane %v1557_v42, %v4576_v40  ;;  %v1580_v49 = vrot.slane %v1572_v43, %v4576_v40  ;;  %v1587_v1 = vrot.slane %v1573_v44, %v4576_v40  ;;  %v4817_v23 = vpop.eup %3949 }
 0x40d   : > { %v2254_v24 = vsel %vm1804_vm3, %v4817_v23, 0.0 }
 0x40e   : > { %v1660_v2 = vcombine.low %v1564_v47, %v1571_v48  ;;  %v3589_v50 = vcombine.high %v1564_v47, %v1571_v48  ;;  %v1676_v51 = vcombine.low %v1580_v49, %v1587_v1  ;;  %v3590_v52 = vcombine.high %v1580_v49, %v1587_v1 }
 0x410   : > { %v1667_v53 = vrot.slane %v1660_v2, %v4574_v33  ;;  %v1675_v54 = vrot.slane %v3589_v50, %v4574_v33  ;;  %v1683_v55 = vrot.slane %v1676_v51, %v4574_v33  ;;  %v1691_v56 = vrot.slane %v3590_v52, %v4574_v33 }
 0x412   : > { %v1692_v57 = vcombine.low %v1667_v53, %v1675_v54  ;;  %v1708_v4 = vcombine.low %v1683_v55, %v1691_v56  ;;  %v1693_v5 = vcombine.high %v1667_v53, %v1675_v54  ;;  %v1709_v17 = vcombine.high %v1683_v55, %v1691_v56 }
 0x413   : > { %1510 = vrot.lane.b32.xlu1 %v4559_v20, %s4170_s17 }
 0x414   : > { %v1700_v60 = vrot.slane %v1692_v57, %v4576_v40  ;;  %v1716_v16 = vrot.slane %v1708_v4, %v4576_v40  ;;  %v1707_v61 = vrot.slane %v1693_v5, %v4576_v40  ;;  %v1723_v15 = vrot.slane %v1709_v17, %v4576_v40 }
 0x416   : > { %v1724_v63 = vcombine.low %v1700_v60, %v1716_v16  ;;  %v1725_v58 = vcombine.high %v1700_v60, %v1716_v16  ;;  %v1726_v59 = vcombine.low %v1707_v61, %v1723_v15  ;;  %v1727_v0 = vcombine.high %v1707_v61, %v1723_v15 }
 0x417   : > { %1514 = vrot.lane.b32.xlu1 %v4566_v22, %s4170_s17  ;;  %v2215_v22 = vsub.f32 %v4741_v45, %v4769_v12 }
 0x418   : > { %v1796_v6 = vpack.c.bf16 %v1724_v63, %v1724_v63  ;;  %v1797_v7 = vpack.c.bf16 %v1725_v58, %v1725_v58  ;;  %v1798_v31 = vpack.c.bf16 %v1726_v59, %v1726_v59  ;;  %v1799_v35 = vpack.c.bf16 %v1727_v0, %v1727_v0 }
 0x419   : > { %v2229_v13 = vmul.f32 1.442695, %v2215_v22 }
 0x41a   : > { %v2286_v20 = vsel %vm2284_vm4, %v1796_v6, 0  ;;  %v2332_v8 = vsel %vm2284_vm4, %v1797_v7, 0  ;;  %v2378_v39 = vsel %vm2284_vm4, %v1798_v31, 0  ;;  %v2424_v27 = vsel %vm2284_vm4, %v1799_v35, 0 }
 0x41b   : > { %3750 = vmatpush3.bf16.msra.mxu1 %v2286_v20  ;;  %3756 = vmatpush3.bf16.msra.mxu0 %v2332_v8  ;;  %3951 = vpow2.f32 %v2229_v13 }
 0x41c   : > { %3761 = vmatprep.subr.bf16.mxu1 %v4164_v3  ;;  %3767 = vmatprep.subr.bf16.mxu0 %v4164_v3 }
 0x420   : > { %1506 = vrot.lane.b32.xlu0 %v4557_v19, %s4170_s17  ;;  %s5126_s17 = scalar_lea.vmem %s5067_s5, %s4466_s26 }
 0x425   : > { %v4821_v26 = vpop.eup %3951 }
 0x426   : > { %v2251_v19 = vsel %vm1804_vm3, %v4821_v26, 0.0 }
 0x43b   : > { %2255 = vadd.xlane.f32.xlu1 %v2254_v24 }
 0x43f   : > { %2252 = vadd.xlane.f32.xlu0 %v2251_v19 }
 0x480   : > { %v2235_v21 = vpop.xlane.xlu1 %2234 }
 0x481   : > { %3953 = vrcp.f32 %v2235_v21  ;;  %v2238_v45 = vpop.xlane.xlu0 %2237 }
 0x482   : > { %3955 = vrcp.f32 %v2238_v45 }
 0x48b   : > { %v2241_v12 = vpop.xlane.xlu0 %2240  ;;  %v3954_v28 = vpop.eup %3953 }
 0x48c   : > { %3957 = vrcp.f32 %v2241_v12  ;;  %v3956_v29 = vpop.eup %3955  ;;  %v2265_v30 = vmul.f32 %v3954_v28, %v4759_v62 }
 0x48d   : > { %v2266_v34 = vmul.f32 %v3956_v29, %v4761_v14 }
 0x48e   : > { %v2273_v37 = vpack.c.bf16 %v2265_v30, %v2265_v30 }
 0x48f   : > { %v2244_v36 = vpop.xlane.xlu1 %2243  ;;  %v2274_v38 = vpack.c.bf16 %v2266_v34, %v2266_v34 }
 0x490   : > { %3959 = vrcp.f32 %v2244_v36  ;;  %3752 = vmatmul.mubr.msk.bf16.vlgmr.msra.gmra.mrb[16].mxu1 %vm1804_vm3, %v2273_v37 }
 0x491   : > { %3758 = vmatmul.mubr.msk.bf16.vlgmr.msra.gmra.mrb[20].mxu0 %vm1804_vm3, %v2274_v38  ;;  %3762 = vmatpush3.bf16.msra.mxu1 %v2378_v39 }
 0x492   : > { %3768 = vmatpush3.bf16.msra.mxu0 %v2424_v27  ;;  %3763 = vmatprep.mubr.msk.bf16.mxu1 %vm4165_vm1, %v4164_v3 }
 0x493   : > { %v2247_v41 = vpop.xlane.xlu0 %2246  ;;  %3769 = vmatprep.mubr.msk.bf16.mxu0 %vm4165_vm1, %v4164_v3  ;;  %3773 = vmatprep.subr.bf16.mxu1 %v4164_v3  ;;  %v1511_v62 = vpop.permute.xlu1 %1510 }
 0x494   : > { %3779 = vmatprep.subr.bf16.mxu0 %v4164_v3  ;;  %v1592_v48 = vcombine.low %v1503_v46, %v1511_v62  ;;  %v1593_v49 = vcombine.high %v1503_v46, %v1511_v62  ;;  %3961 = vrcp.f32 %v2247_v41 }
 0x496   : > { %v3958_v14 = vpop.eup %3957  ;;  %v1600_v54 = vrot.slane %v1592_v48, %v4574_v33 }
 0x497   : > { %v2267_v42 = vmul.f32 %v3958_v14, %v4767_v11  ;;  %v2250_v43 = vpop.xlane.xlu0 %2249  ;;  %v1515_v2 = vpop.permute.xlu1 %1514  ;;  %v1607_v11 = vrot.slane %v1593_v49, %v4574_v33 }
 0x498   : > { %3963 = vrcp.f32 %v2250_v43 }
 0x499   : > { %v2275_v44 = vpack.c.bf16 %v2267_v42, %v2267_v42 }
 0x49a   : > { %v3960_v47 = vpop.eup %3959 }
 0x49b   : > { %v2268_v1 = vmul.f32 %v3960_v47, %v4775_v18  ;;  %3764 = vmatmul.mubr.msk.bf16.vlgmr.msra.gmra.mrb[20].mxu1 %vm1804_vm3, %v2275_v44  ;;  %v1507_v50 = vpop.permute.xlu0 %1506 }
 0x49c   : > { %v1608_v51 = vcombine.low %v1507_v50, %v1515_v2  ;;  %v1609_v52 = vcombine.high %v1507_v50, %v1515_v2  ;;  %3775 = vmatprep.mubr.msk.bf16.mxu1 %vm4165_vm1, %v4164_v3 }
 0x49d   : > { %v2276_v53 = vpack.c.bf16 %v2268_v1, %v2268_v1 }
 0x49e   : > { %v1616_v55 = vrot.slane %v1608_v51, %v4574_v33  ;;  %v1623_v56 = vrot.slane %v1609_v52, %v4574_v33  ;;  %v3962_v13 = vpop.eup %3961 }
 0x49f   : > { %3770 = vmatmul.mubr.msk.bf16.vlgmr.msra.gmra.mrb[24].mxu0 %vm1804_vm3, %v2276_v53  ;;  %v2269_v31 = vmul.f32 %v3962_v13, %v4779_v25 }
 0x4a0   : > { %v1624_v18 = vcombine.low %v1600_v54, %v1616_v55  ;;  %v1625_v57 = vcombine.high %v1600_v54, %v1616_v55  ;;  %v1640_v4 = vcombine.low %v1607_v11, %v1623_v56  ;;  %v1641_v5 = vcombine.high %v1607_v11, %v1623_v56  ;;  %3781 = vmatprep.mubr.msk.bf16.mxu0 %vm4165_vm1, %v4164_v3 }
 0x4a1   : > { %v2277_v41 = vpack.c.bf16 %v2269_v31, %v2269_v31 }
 0x4a2   : > { %v1632_v17 = vrot.slane %v1624_v18, %v4576_v40  ;;  %v1639_v60 = vrot.slane %v1625_v57, %v4576_v40  ;;  %v1648_v16 = vrot.slane %v1640_v4, %v4576_v40  ;;  %v1655_v61 = vrot.slane %v1641_v5, %v4576_v40  ;;  %v3964_v45 = vpop.eup %3963 }
 0x4a3   : > { %v2270_v34 = vmul.f32 %v3964_v45, %v4783_v32 }
 0x4a4   : > { %v1728_v15 = vcombine.low %v1632_v17, %v1639_v60  ;;  %v3591_v63 = vcombine.high %v1632_v17, %v1639_v60  ;;  %v1744_v58 = vcombine.low %v1648_v16, %v1655_v61  ;;  %v3592_v59 = vcombine.high %v1648_v16, %v1655_v61 }
 0x4a5   : > { %v2278_v62 = vpack.c.bf16 %v2270_v34, %v2270_v34 }
 0x4a6   : > { %v1735_v0 = vrot.slane %v1728_v15, %v4574_v33  ;;  %v1743_v6 = vrot.slane %v3591_v63, %v4574_v33  ;;  %v1751_v7 = vrot.slane %v1744_v58, %v4574_v33  ;;  %v1759_v20 = vrot.slane %v3592_v59, %v4574_v33 }
 0x4a8   : > { %v1760_v8 = vcombine.low %v1735_v0, %v1743_v6  ;;  %v1776_v9 = vcombine.low %v1751_v7, %v1759_v20  ;;  %v1761_v22 = vcombine.high %v1735_v0, %v1743_v6  ;;  %v1777_v10 = vcombine.high %v1751_v7, %v1759_v20 }
 0x4aa   : > { %v1768_v24 = vrot.slane %v1760_v8, %v4576_v40  ;;  %v1784_v19 = vrot.slane %v1776_v9, %v4576_v40  ;;  %v1775_v46 = vrot.slane %v1761_v22, %v4576_v40  ;;  %v1791_v21 = vrot.slane %v1777_v10, %v4576_v40 }
 0x4ac   : > { %v1792_v12 = vcombine.low %v1768_v24, %v1784_v19  ;;  %v1793_v28 = vcombine.high %v1768_v24, %v1784_v19  ;;  %v1794_v29 = vcombine.low %v1775_v46, %v1791_v21  ;;  %v1795_v30 = vcombine.high %v1775_v46, %v1791_v21 }
 0x4ae   : > { %v1800_v35 = vpack.c.bf16 %v1792_v12, %v1792_v12  ;;  %v1801_v36 = vpack.c.bf16 %v1793_v28, %v1793_v28  ;;  %v1802_v39 = vpack.c.bf16 %v1794_v29, %v1794_v29  ;;  %v1803_v27 = vpack.c.bf16 %v1795_v30, %v1795_v30 }
 0x4b0   : > { %v2470_v37 = vsel %vm2284_vm4, %v1800_v35, 0  ;;  %v2516_v38 = vsel %vm2284_vm4, %v1801_v36, 0  ;;  %v2562_v25 = vsel %vm2284_vm4, %v1802_v39, 0  ;;  %v2608_v32 = vsel %vm2284_vm4, %v1803_v27, 0 }
 0x4b1   : > { %3774 = vmatpush3.bf16.msra.mxu1 %v2470_v37  ;;  %3780 = vmatpush3.bf16.msra.mxu0 %v2516_v38 }
 0x4b2   : > { %3785 = vmatprep.subr.bf16.mxu1 %v4164_v3  ;;  %3791 = vmatprep.subr.bf16.mxu0 %v4164_v3 }
 0x4b4   : > { %3776 = vmatmul.mubr.msk.bf16.vlgmr.msra.gmra.mrb[24].mxu1 %vm1804_vm3, %v2277_v41  ;;  %3782 = vmatmul.mubr.msk.bf16.vlgmr.msra.gmra.mrb[28].mxu0 %vm1804_vm3, %v2278_v62 }
 0x4b5   : > { %3786 = vmatpush3.bf16.msra.mxu1 %v2562_v25  ;;  %3792 = vmatpush3.bf16.msra.mxu0 %v2608_v32 }
 0x4b6   : > { %3793 = vmatprep.mubr.msk.bf16.mxu0 %vm4165_vm1, %v4164_v3  ;;  %3787 = vmatprep.mubr.msk.bf16.mxu1 %vm4165_vm1, %v4164_v3 }
 0x4b7   : > { %3797 = vmatprep.subr.bf16.mxu1 %v4164_v3  ;;  %3805 = vmatprep.subr.bf16.mxu0 %v4164_v3 }
 0x4c8   : > { %v2256_v14 = vpop.xlane.xlu1 %2255 }
 0x4c9   : > { %3965 = vrcp.f32 %v2256_v14 }
 0x4cc   : > { %v2253_v42 = vpop.xlane.xlu0 %2252 }
 0x4cd   : > { %3967 = vrcp.f32 %v2253_v42 }
 0x4d3   : > { %v3966_v43 = vpop.eup %3965 }
 0x4d4   : > { %v2272_v44 = vmul.f32 %v3966_v43, %v4817_v23 }
 0x4d6   : > { %v2280_v47 = vpack.c.bf16 %v2272_v44, %v2272_v44 }
 0x4d7   : > { %v3968_v48 = vpop.eup %3967 }
 0x4d8   : > { %v2271_v49 = vmul.f32 %v3968_v48, %v4821_v26  ;;  %3794 = vmatmul.mubr.msk.bf16.vlgmr.msra.gmra.mrb[32].mxu0 %vm1804_vm3, %v2280_v47 }
 0x4d9   : > { %3809 = vmatprep.mubr.msk.bf16.mxu0 %vm4165_vm1, %v4164_v3 }
 0x4da   : > { %v2279_v1 = vpack.c.bf16 %v2271_v49, %v2271_v49 }
 0x4dc   : > { %3788 = vmatmul.mubr.msk.bf16.vlgmr.msra.gmra.mrb[28].mxu1 %vm1804_vm3, %v2279_v1 }
 0x4dd   : > { %3801 = vmatprep.mubr.msk.bf16.mxu1 %vm4165_vm1, %v4164_v3 }
 0x563   : > { %v2322_v2 = vpop.f32.mrb[16].mxu1 }
 0x564   : > { %v2368_v50 = vpop.f32.mrb[20].mxu0  ;;  %v3753_v51 = vpop.f32.mrb[17].mxu1 }
 0x565   : > { %v3759_v52 = vpop.f32.mrb[21].mxu0  ;;  %v2325_v23 = vpop.f32.mrb[18].mxu1 }
 0x566   : > { %v2371_v53 = vpop.f32.mrb[22].mxu0  ;;  %v3754_v54 = vpop.f32.mrb[19].mxu1 }
 0x567   : > { %v3760_v11 = vpop.f32.mrb[23].mxu0 }
 0x56e   : > { %v2414_v26 = vpop.f32.mrb[20].mxu1 }
 0x56f   : > { %v2650_v55 = vcombine.low %v2322_v2, %v2414_v26  ;;  %v2651_v56 = vcombine.high %v2322_v2, %v2414_v26  ;;  %v3765_v18 = vpop.f32.mrb[21].mxu1 }
 0x570   : > { %v2417_v57 = vpop.f32.mrb[22].mxu1 }
 0x571   : > { %v3766_v4 = vpop.f32.mrb[23].mxu1  ;;  %v2658_v15 = vrot.slane %v2650_v55, %v4574_v33  ;;  %v2665_v63 = vrot.slane %v2651_v56, %v4574_v33 }
 0x572   : > { %v2460_v5 = vpop.f32.mrb[24].mxu0 }
 0x573   : > { %v2666_v17 = vcombine.low %v2368_v50, %v2460_v5  ;;  %v2667_v60 = vcombine.high %v2368_v50, %v2460_v5  ;;  %v3771_v16 = vpop.f32.mrb[25].mxu0 }
 0x574   : > { %v2463_v61 = vpop.f32.mrb[26].mxu0 }
 0x575   : > { %v2674_v58 = vrot.slane %v2666_v17, %v4574_v33  ;;  %v2681_v59 = vrot.slane %v2667_v60, %v4574_v33  ;;  %v3772_v0 = vpop.f32.mrb[27].mxu0 }
 0x577   : > { %v2682_v6 = vcombine.low %v2658_v15, %v2674_v58  ;;  %v2683_v7 = vcombine.high %v2658_v15, %v2674_v58  ;;  %v2698_v20 = vcombine.low %v2665_v63, %v2681_v59  ;;  %v2699_v8 = vcombine.high %v2665_v63, %v2681_v59 }
 0x579   : > { %v2690_v9 = vrot.slane %v2682_v6, %v4576_v40  ;;  %v2697_v22 = vrot.slane %v2683_v7, %v4576_v40  ;;  %v2706_v10 = vrot.slane %v2698_v20, %v4576_v40  ;;  %v2713_v13 = vrot.slane %v2699_v8, %v4576_v40  ;;  %v3929_v8 = vld [vmem:[%s5124_s28] sm:$0xff]   ;;  %s5128_s28 = scalar_lea.vmem %s5069_s7, %s4466_s26 }
 0x57a   : > { %3798 = vmatpush3.bf16.msra.mxu1 %v3929_v8  ;;  %v3934_v8 = vld [vmem:[%s4492_s0 + $0x8] sm:$0xff]  }
 0x57b   : > { %v2786_v24 = vcombine.low %v2690_v9, %v2697_v22  ;;  %v3609_v19 = vcombine.high %v2690_v9, %v2697_v22  ;;  %v2802_v46 = vcombine.low %v2706_v10, %v2713_v13  ;;  %v3610_v21 = vcombine.high %v2706_v10, %v2713_v13  ;;  %3799 = vmatprep.subr.bf16.mxu1 %v4164_v3 }
 0x57d   : > { %v2793_v45 = vrot.slane %v2786_v24, %v4574_v33  ;;  %v2801_v12 = vrot.slane %v3609_v19, %v4574_v33  ;;  %v2809_v28 = vrot.slane %v2802_v46, %v4574_v33  ;;  %v2817_v29 = vrot.slane %v3610_v21, %v4574_v33 }
 0x57f   : > { %v2819_v30 = vcombine.high %v2793_v45, %v2801_v12  ;;  %v2835_v31 = vcombine.high %v2809_v28, %v2817_v29  ;;  %v2818_v34 = vcombine.low %v2793_v45, %v2801_v12  ;;  %v2834_v35 = vcombine.low %v2809_v28, %v2817_v29 }
 0x581   : > { %v4898_v36 = vrot.slane %v2819_v30, %v4576_v40  ;;  %v4901_v37 = vrot.slane %v2835_v31, %v4576_v40  ;;  %v4904_v38 = vrot.slane %v2818_v34, %v4576_v40  ;;  %v4907_v39 = vrot.slane %v2834_v35, %v4576_v40  ;;  %v3930_v30 = vld [vmem:[%s5125_s19 + $0x8] sm:$0xff]  }
 0x582   : > { %3800 = vmatpush3.bf16.msra.mxu1 %v3930_v30  ;;  %v3618_v30 = vld [vmem:[%s5128_s28] ss:$0 sm:$0xff] }
 0x583   : > { %v2852_v27 = vcombine.low %v4898_v36, %v4901_v37  ;;  %v2850_v41 = vcombine.low %v4904_v38, %v4907_v39  ;;  %v2851_v62 = vcombine.high %v4904_v38, %v4907_v39  ;;  %v2853_v25 = vcombine.high %v4898_v36, %v4901_v37  ;;  %3813 = vmatprep.subr.bf16.mxu1 %v4164_v3  ;;  %v3613_v38 = vld [vmem:[%s5126_s17] ss:$0 sm:$0xff] }
 0x587   : > { %v2506_v32 = vpop.f32.mrb[24].mxu1  ;;  %v2552_v14 = vpop.f32.mrb[28].mxu0 }
 0x588   : > { %v3777_v42 = vpop.f32.mrb[25].mxu1  ;;  %v3783_v43 = vpop.f32.mrb[29].mxu0 }
 0x589   : > { %v2509_v44 = vpop.f32.mrb[26].mxu1  ;;  %v2555_v47 = vpop.f32.mrb[30].mxu0 }
 0x58a   : > { %v3778_v48 = vpop.f32.mrb[27].mxu1  ;;  %v3784_v49 = vpop.f32.mrb[31].mxu0 }
 0x5ab   : > { %v2644_v1 = vpop.f32.mrb[32].mxu0 }
 0x5ac   : > { %v2734_v2 = vcombine.low %v2552_v14, %v2644_v1  ;;  %v2735_v50 = vcombine.high %v2552_v14, %v2644_v1  ;;  %v3795_v51 = vpop.f32.mrb[33].mxu0 }
 0x5ad   : > { %v2647_v52 = vpop.f32.mrb[34].mxu0 }
 0x5ae   : > { %v3796_v23 = vpop.f32.mrb[35].mxu0  ;;  %v2742_v56 = vrot.slane %v2734_v2, %v4574_v33  ;;  %v2749_v18 = vrot.slane %v2735_v50, %v4574_v33 }
 0x5af   : > { %v2598_v53 = vpop.f32.mrb[28].mxu1 }
 0x5b0   : > { %v2718_v54 = vcombine.low %v2506_v32, %v2598_v53  ;;  %v2719_v11 = vcombine.high %v2506_v32, %v2598_v53  ;;  %v3789_v26 = vpop.f32.mrb[29].mxu1 }
 0x5b1   : > { %v2601_v55 = vpop.f32.mrb[30].mxu1  ;;  %v3977_v26 = vld [vmem:[#allocation8] sm:$0xff] }
 0x5b2   : > { %v2726_v57 = vrot.slane %v2718_v54, %v4574_v33  ;;  %v2733_v4 = vrot.slane %v2719_v11, %v4574_v33  ;;  %v3790_v5 = vpop.f32.mrb[31].mxu1 }
 0x5b4   : > { %v2750_v17 = vcombine.low %v2726_v57, %v2742_v56  ;;  %v2751_v60 = vcombine.high %v2726_v57, %v2742_v56  ;;  %v2766_v16 = vcombine.low %v2733_v4, %v2749_v18  ;;  %v2767_v61 = vcombine.high %v2733_v4, %v2749_v18  ;;  %v3978_v18 = vld [vmem:[#allocation8 + $0x8] sm:$0xff] }
 0x5b6   : > { %v2758_v15 = vrot.slane %v2750_v17, %v4576_v40  ;;  %v2765_v63 = vrot.slane %v2751_v60, %v4576_v40  ;;  %v2774_v58 = vrot.slane %v2766_v16, %v4576_v40  ;;  %v2781_v59 = vrot.slane %v2767_v61, %v4576_v40 }
 0x5b8   : > { %v2854_v0 = vcombine.low %v2758_v15, %v2765_v63  ;;  %v3611_v6 = vcombine.high %v2758_v15, %v2765_v63  ;;  %v2870_v7 = vcombine.low %v2774_v58, %v2781_v59  ;;  %v3612_v20 = vcombine.high %v2774_v58, %v2781_v59 }
 0x5ba   : > { %v2861_v9 = vrot.slane %v2854_v0, %v4574_v33  ;;  %v2869_v22 = vrot.slane %v3611_v6, %v4574_v33  ;;  %v2877_v10 = vrot.slane %v2870_v7, %v4574_v33  ;;  %v2885_v13 = vrot.slane %v3612_v20, %v4574_v33  ;;  %v3931_v6 = vld [vmem:[%s664_s12] sm:$0xff]   ;;  %v3932_v7 = vld [vmem:[%s664_s12 + $0x8] sm:$0xff]  }
 0x5bb   : > { %3806 = vmatpush3.bf16.msra.mxu0 %v3931_v6  ;;  %v3933_v20 = vld [vmem:[%s4492_s0] sm:$0xff]  }
 0x5bc   : > { %v2887_v24 = vcombine.high %v2861_v9, %v2869_v22  ;;  %v2903_v19 = vcombine.high %v2877_v10, %v2885_v13  ;;  %v2886_v46 = vcombine.low %v2861_v9, %v2869_v22  ;;  %v2902_v21 = vcombine.low %v2877_v10, %v2885_v13  ;;  %3807 = vmatprep.subr.bf16.mxu0 %v4164_v3  ;;  %v3630_v6 = vld [vmem:[%s797_s8] ss:$0 sm:$0xff] }
 0x5be   : > { %v2901_v45 = vrot.slane %v2887_v24, %v4576_v40  ;;  %v2917_v12 = vrot.slane %v2903_v19, %v4576_v40  ;;  %v2894_v28 = vrot.slane %v2886_v46, %v4576_v40  ;;  %v2910_v29 = vrot.slane %v2902_v21, %v4576_v40  ;;  %v3617_v21 = vld [vmem:[%s5127_s15] ss:$0 sm:$0xff] }
 0x5bf   : > { %3808 = vmatpush3.bf16.msra.mxu0 %v3932_v7 }
 0x5c0   : > { %v2920_v31 = vcombine.low %v2901_v45, %v2917_v12  ;;  %v2919_v34 = vcombine.high %v2894_v28, %v2910_v29  ;;  %v2918_v33 = vcombine.low %v2894_v28, %v2910_v29  ;;  %v2921_v35 = vcombine.high %v2901_v45, %v2917_v12 }
 0x5c2   : > { %v3917_v36 = vpack.i.bf16 %v2920_v31, %v2852_v27  ;;  %v3912_v37 = vpack.i.bf16 %v2919_v34, %v2851_v62  ;;  %v3922_v32 = vpack.i.bf16 %v2921_v35, %v2853_v25 }
 0x5c4   : > { %3918 = vrot.lane.b32.xlu1 %v3917_v36, %s4173_s20  ;;  %3913 = vrot.lane.b32.xlu0 %v3912_v37, %s4174_s30  ;;  %v3935_v36 = vld [vmem:[%s4492_s0 + $0x10] sm:$0xff]   ;;  %v3936_v37 = vld [vmem:[%s4492_s0 + $0x18] sm:$0xff]  }
 0x5c8   : > { %3923 = vrot.lane.b32.xlu0 %v3922_v32, %s4175_s16  ;;  %v3619_v32 = vld [vmem:[%s783_s21] ss:$0 sm:$0xff] }
 0x636   : > { %v3919_v40 = vpop.permute.xlu1 %3918  ;;  %v3914_v14 = vpop.permute.xlu0 %3913 }
 0x637   : > { %v3916_v42 = vunpack.i.h.bf16 %v3914_v14  ;;  %v3915_v43 = vunpack.i.l.bf16 %v3914_v14  ;;  %v3921_v44 = vunpack.i.h.bf16 %v3919_v40  ;;  %v3920_v47 = vunpack.i.l.bf16 %v3919_v40 }
 0x639   : > { %v2946_v27 = vsel %vm1804_vm3, %v2850_v41, %v3915_v43  ;;  %v2947_v62 = vsel %vm1804_vm3, %v2918_v33, %v3916_v42 }
 0x63a   : > { %v3924_v25 = vpop.permute.xlu0 %3923  ;;  %v2949_v1 = vsel %vm2948_vm5, %v2946_v27, %v3920_v47  ;;  %v2950_v2 = vsel %vm2948_vm5, %v2947_v62, %v3921_v44 }
 0x63b   : > { %v3926_v48 = vunpack.i.h.bf16 %v3924_v25  ;;  %v3925_v49 = vunpack.i.l.bf16 %v3924_v25 }
 0x63d   : > { %v2952_v50 = vsel %vm2951_vm6, %v2949_v1, %v3925_v49  ;;  %v2953_v51 = vsel %vm2951_vm6, %v2950_v2, %v3926_v48 }
 0x63e   : > { %v2954_v52 = vpack.c.bf16 %v2953_v51, %v2952_v50 }
 0x640   : > { %3802 = vmatmul.mubr.msk.bf16.vlgmr.msra.gmra.mrb[32].mxu1 %vm835_vm2, %v2954_v52 }
 0x641   : > { %3821 = vmatprep.mubr.msk.bf16.mxu1 %vm4165_vm1, %v4164_v3  ;;  %3814 = vmatpush3.bf16.msra.mxu1 %v3933_v20 }
 0x642   : > { %3815 = vmatprep.subr.bf16.mxu1 %v4164_v3 }
 0x645   : > { %3816 = vmatpush3.bf16.msra.mxu1 %v3934_v8 }
 0x646   : > { %3817 = vmatprep.subr.bf16.mxu1 %v4164_v3 }
 0x649   : > { %3818 = vmatpush3.bf16.msra.mxu1 %v3935_v36 }
 0x64a   : > { %3819 = vmatprep.subr.bf16.mxu1 %v4164_v3  ;;  %v3623_v3 = vld [vmem:[%s791_s25] ss:$0 sm:$0xff] }
 0x64d   : > { %3820 = vmatpush3.bf16.msra.mxu1 %v3936_v37 }
 0x713   : > { %v3015_v39 = vpop.f32.mrb[32].mxu1 }
 0x714   : > { %v3016_v41 = vadd.f32 %v3613_v38, %v3015_v39  ;;  %v3803_v23 = vpop.f32.mrb[33].mxu1 }
 0x715   : > { %v3018_v53 = vpop.f32.mrb[34].mxu1 }
 0x716   : > { %v3019_v54 = vadd.f32 %v3613_v38, %v3018_v53  ;;  %v3804_v11 = vpop.f32.mrb[35].mxu1  ;;  %v3022_v55 = vadd.f32 %v3977_v26, %v3016_v41 }
 0x718   : > { %v3026_v56 = vsel %vm835_vm2, %v3022_v55, 0.0  ;;  %v3023_v57 = vadd.f32 %v3978_v18, %v3019_v54 }
 0x719   : > { %3027 = vadd.xlane.f32.xlu1 %v3026_v56 }
 0x71a   : > { %v3029_v4 = vsel %vm835_vm2, %v3023_v57, 0.0 }
 0x71b   : > { %3030 = vadd.xlane.f32.xlu0 %v3029_v4 }
 0x7a6   : > { %v3028_v5 = vpop.xlane.xlu1 %3027 }
 0x7a7   : > { %v3033_v17 = vmul.f32 0.03125, %v3028_v5 }
 0x7a8   : > { %v3031_v60 = vpop.xlane.xlu0 %3030 }
 0x7a9   : > { %v3035_v16 = vsub.f32 %v3022_v55, %v3033_v17  ;;  %v3034_v61 = vmul.f32 0.03125, %v3031_v60 }
 0x7ab   : > { %v3036_v15 = vsub.f32 %v3023_v57, %v3034_v61  ;;  %v3037_v63 = vmul.f32 %v3035_v16, %v3035_v16 }
 0x7ad   : > { %v3039_v58 = vsel %vm835_vm2, %v3037_v63, 0.0  ;;  %v3038_v59 = vmul.f32 %v3036_v15, %v3036_v15 }
 0x7ae   : > { %3040 = vadd.xlane.f32.xlu0 %v3039_v58  ;;  %v3629_v58 = vld [vmem:[%s794_s4] ss:$0 sm:$0xff] }
 0x7af   : > { %v3042_v0 = vsel %vm835_vm2, %v3038_v59, 0.0 }
 0x7b0   : > { %3043 = vadd.xlane.f32.xlu1 %v3042_v0 }
 0x83b   : > { %v3041_v9 = vpop.xlane.xlu0 %3040 }
 0x83c   : > { %v3045_v22 = vmul.f32 0.03125, %v3041_v9 }
 0x83d   : > { %v3044_v10 = vpop.xlane.xlu1 %3043 }
 0x83e   : > { %v3047_v13 = vadd.f32 1e-05, %v3045_v22  ;;  %v3046_v24 = vmul.f32 0.03125, %v3044_v10 }
 0x840   : > { %3969 = vrsqrt.f32 %v3047_v13  ;;  %v3048_v19 = vadd.f32 1e-05, %v3046_v24 }
 0x842   : > { %3971 = vrsqrt.f32 %v3048_v19 }
 0x84a   : > { %v3970_v46 = vpop.eup %3969 }
 0x84b   : > { %v3051_v45 = vmul.f32 %v3970_v46, %v3035_v16 }
 0x84c   : > { %v3972_v12 = vpop.eup %3971 }
 0x84d   : > { %v3059_v28 = vmul.f32 %v3617_v21, %v3051_v45  ;;  %v3052_v29 = vmul.f32 %v3972_v12, %v3036_v15 }
 0x84f   : > { %v3060_v31 = vmul.f32 %v3617_v21, %v3052_v29  ;;  %v3067_v34 = vadd.f32 %v3618_v30, %v3059_v28 }
 0x851   : > { %v3068_v33 = vadd.f32 %v3618_v30, %v3060_v31 }
 0x853   : > { %v3069_v35 = vpack.c.bf16 %v3068_v33, %v3067_v34 }
 0x855   : > { %3810 = vmatmul.mubr.msk.bf16.vlgmr.msra.gmra.mrb[36].mxu0 %vm835_vm2, %v3069_v35 }
 0x928   : > { %v3130_v40 = vpop.f32.mrb[36].mxu0 }
 0x929   : > { %v3131_v14 = vadd.f32 %v3619_v32, %v3130_v40  ;;  %v3811_v42 = vpop.f32.mrb[37].mxu0 }
 0x92a   : > { %v3133_v43 = vpop.f32.mrb[38].mxu0 }
 0x92b   : > { %v3134_v44 = vadd.f32 %v3619_v32, %v3133_v43  ;;  %v3812_v47 = vpop.f32.mrb[39].mxu0  ;;  %v3137_v27 = vmax.f32 %v3131_v14, 0.0 }
 0x92d   : > { %v3138_v62 = vmax.f32 %v3134_v44, 0.0 }
 0x92f   : > { %v3139_v25 = vpack.c.bf16 %v3138_v62, %v3137_v27 }
 0x931   : > { %3822 = vmatmul.mubr.msk.bf16.vlgmr.msra.gmra.mrb[36].mxu1 %vm3179_vm7, %v3139_v25 }
 0xa04   : > { %v3217_v48 = vpop.f32.mrb[36].mxu1 }
 0xa05   : > { %v3218_v49 = vadd.f32 %v3623_v3, %v3217_v48  ;;  %v3823_v1 = vpop.f32.mrb[37].mxu1 }
 0xa06   : > { %v3220_v2 = vpop.f32.mrb[38].mxu1 }
 0xa07   : > { %v3221_v50 = vadd.f32 %v3623_v3, %v3220_v2  ;;  %v3824_v51 = vpop.f32.mrb[39].mxu1  ;;  %v3224_v52 = vadd.f32 %v3218_v49, %v3067_v34 }
 0xa09   : > { %v3228_v38 = vsel %vm835_vm2, %v3224_v52, 0.0  ;;  %v3225_v39 = vadd.f32 %v3221_v50, %v3068_v33 }
 0xa0a   : > { %3229 = vadd.xlane.f32.xlu0 %v3228_v38 }
 0xa0b   : > { %v3231_v41 = vsel %vm835_vm2, %v3225_v39, 0.0 }
 0xa0c   : > { %3232 = vadd.xlane.f32.xlu1 %v3231_v41 }
 0xa97   : > { %v3230_v23 = vpop.xlane.xlu0 %3229 }
 0xa98   : > { %v3234_v53 = vmul.f32 0.03125, %v3230_v23 }
 0xa99   : > { %v3233_v54 = vpop.xlane.xlu1 %3232 }
 0xa9a   : > { %v3236_v11 = vsub.f32 %v3224_v52, %v3234_v53  ;;  %v3235_v26 = vmul.f32 0.03125, %v3233_v54 }
 0xa9c   : > { %v3237_v55 = vsub.f32 %v3225_v39, %v3235_v26  ;;  %v3238_v56 = vmul.f32 %v3236_v11, %v3236_v11 }
 0xa9e   : > { %v3240_v18 = vsel %vm835_vm2, %v3238_v56, 0.0  ;;  %v3239_v57 = vmul.f32 %v3237_v55, %v3237_v55 }
 0xa9f   : > { %3241 = vadd.xlane.f32.xlu0 %v3240_v18 }
 0xaa0   : > { %v3243_v4 = vsel %vm835_vm2, %v3239_v57, 0.0 }
 0xaa1   : > { %3244 = vadd.xlane.f32.xlu1 %v3243_v4 }
 0xb2c   : > { %v3242_v5 = vpop.xlane.xlu0 %3241 }
 0xb2d   : > { %v3246_v17 = vmul.f32 0.03125, %v3242_v5 }
 0xb2e   : > { %v3245_v60 = vpop.xlane.xlu1 %3244 }
 0xb2f   : > { %v3248_v16 = vadd.f32 1e-05, %v3246_v17  ;;  %v3247_v61 = vmul.f32 0.03125, %v3245_v60 }
 0xb31   : > { %3973 = vrsqrt.f32 %v3248_v16  ;;  %v3249_v15 = vadd.f32 1e-05, %v3247_v61 }
 0xb33   : > { %3975 = vrsqrt.f32 %v3249_v15 }
 0xb3b   : > { %v3974_v63 = vpop.eup %3973 }
 0xb3c   : > { %v3252_v59 = vmul.f32 %v3974_v63, %v3236_v11  ;;  %3274 = sbr.rel (%p3631_p7) target bundleno = 2885 (0xb45), region = 104 }
 0xb3d   : > { %v3976_v0 = vpop.eup %3975 }
 0xb3e   : > { %v3260_v7 = vmul.f32 %v3629_v58, %v3252_v59  ;;  %v3253_v20 = vmul.f32 %v3976_v0, %v3237_v55 }
 0xb40   : > { %v3268_v8 = vadd.f32 %v3630_v6, %v3260_v7  ;;  %v3261_v9 = vmul.f32 %v3629_v58, %v3253_v20 }
 0xb42   : > { %v3269_v22 = vadd.f32 %v3630_v6, %v3261_v9  ;;  %3275 = vst.msk [vmem:[#allocation8] sm:$0xff] (!%p3631_p7), %vm835_vm2, %v3268_v8 }
 0xb44   : > { %3276 = vst.msk [vmem:[#allocation8 + $0x8] sm:$0xff] %vm835_vm2, %v3269_v22 }
 0xb45 PF: > { %p3632_p10 = scmp.ne.s32.totalorder %s4149_s24, 1 }
 0xb46   : > { %v3282_v10 = vsel (!%p3632_p10), %vm835_vm2, %v3268_v8, 0.0  ;;  %v3285_v13 = vsel (!%p3632_p10), %vm835_vm2, %v3269_v22, 0.0  ;;  %s5131_s4 = sld [smem:[#allocation23_spill]] (!%p3632_p10)  ;;  %s5132_s15 = sld [smem:[#allocation24_spill]] (!%p3632_p10) }
 0xb47   : > { %3279 = sbr.rel (%p3632_p10) target bundleno = 3204 (0xc84), region = 108  ;;  %3283 = vadd.xlane.f32.xlu0 (!%p3632_p10), %v3282_v10 }
 0xb4b   : > { %3286 = vadd.xlane.f32.xlu0 (!%p3632_p10), %v3285_v13 }
 0xb4c   : > { %v3633_v14 = vld [vmem:[%s5131_s4] ss:$0 sm:$0xff] (!%p3632_p10) }
 0xb4d   : > { %v3634_v43 = vld [vmem:[%s5132_s15] ss:$0 sm:$0xff] (!%p3632_p10) }
 0xbd4   : > { %v3284_v24 = vpop.xlane.xlu0 %3283 }
 0xbd5   : > { %v3288_v19 = vmul.f32 0.03125, %v3284_v24 }
 0xbd7   : > { %v3290_v46 = vsub.f32 %v3268_v8, %v3288_v19 }
 0xbd8   : > { %v3287_v21 = vpop.xlane.xlu0 %3286 }
 0xbd9   : > { %v3289_v45 = vmul.f32 0.03125, %v3287_v21  ;;  %v3292_v12 = vmul.f32 %v3290_v46, %v3290_v46 }
 0xbdb   : > { %v3291_v28 = vsub.f32 %v3269_v22, %v3289_v45  ;;  %v3294_v29 = vsel %vm835_vm2, %v3292_v12, 0.0 }
 0xbdc   : > { %3295 = vadd.xlane.f32.xlu1 %v3294_v29 }
 0xbdd   : > { %v3293_v30 = vmul.f32 %v3291_v28, %v3291_v28 }
 0xbdf   : > { %v3297_v31 = vsel %vm835_vm2, %v3293_v30, 0.0 }
 0xbe0   : > { %3298 = vadd.xlane.f32.xlu1 %v3297_v31 }
 0xc69   : > { %v3296_v34 = vpop.xlane.xlu1 %3295 }
 0xc6a   : > { %v3300_v33 = vmul.f32 0.03125, %v3296_v34 }
 0xc6c   : > { %v3302_v35 = vadd.f32 1e-05, %v3300_v33 }
 0xc6d   : > { %v3299_v36 = vpop.xlane.xlu1 %3298 }
 0xc6e   : > { %3979 = vrsqrt.f32 %v3302_v35  ;;  %v3301_v37 = vmul.f32 0.03125, %v3299_v36 }
 0xc70   : > { %v3303_v32 = vadd.f32 1e-05, %v3301_v37 }
 0xc72   : > { %3981 = vrsqrt.f32 %v3303_v32 }
 0xc78   : > { %v3980_v40 = vpop.eup %3979 }
 0xc79   : > { %v3306_v42 = vmul.f32 %v3980_v40, %v3290_v46 }
 0xc7b   : > { %v3314_v44 = vmul.f32 %v3633_v14, %v3306_v42 }
 0xc7c   : > { %v3982_v47 = vpop.eup %3981 }
 0xc7d   : > { %v3322_v27 = vadd.f32 %v3634_v43, %v3314_v44  ;;  %v3307_v62 = vmul.f32 %v3982_v47, %v3291_v28 }
 0xc7f   : > { %3324 = vst.msk [vmem:[#allocation8] sm:$0xff] %vm835_vm2, %v3322_v27  ;;  %v3315_v25 = vmul.f32 %v3633_v14, %v3307_v62 }
 0xc81   : > { %v3323_v3 = vadd.f32 %v3634_v43, %v3315_v25 }
 0xc83   : > { %3325 = vst.msk [vmem:[#allocation8 + $0x8] sm:$0xff] %vm835_vm2, %v3323_v3 }
 0xc84 PF: > { %p3846_p3 = scmp.eq.s32.totalorder %s4292_s27, 1  ;;  %s4176_s2 = smov [#allocation8]  }
 0xc85   : > { %s3335_s14 = sshll.u32 %s4176_s2, 4  ;;  %s3336_s14 = int_to_ptr.vmem [resolvable:$true] %s3335_s14 }
 0xc86   : > { %s4073_s28 = scalar_lea.vmem %s3336_s14, 256  ;;  %p4080_p0 = scmp.lt.s32.totalorder %s3336_s14, %s3336_s14 }
 0xc87   : > { %p4074_p4 = scmp.ne.s32.totalorder %s3336_s14, %s4073_s28  ;;  %p4081_p5 = scmp.lt.s32.totalorder %s4073_s28, %s4073_s28 }
 0xc89   : > { %p4075_p6 = pnand %p4074_p4, %p3846_p3  ;;  %p4082_p13 = por %p4081_p5, %p4080_p0 }
 0xc8b   : > { %p4076_p8 = pneg %p4075_p6 }
 0xc8d   : > { %p4083_p1 = pnand %p4082_p13, %p4076_p8 }
 0xc8f   : > { %4086 = shalt.err (!%p4083_p1)
}
 0xc90   : > { %s5133_s0 = sld [smem:[#allocation25_spill]] }
 0xc96   : > { %s4087_s16 = scalar_lea.hbm %s5133_s0, 256 }
 0xc97   : > { %p4088_p12 = scmp.ne.s32.totalorder %s5133_s0, %s4087_s16  ;;  %p4093_p2 = scmp.lt.u32.totalorder %s4087_s16, %s5133_s0 }
 0xc99   : > { %p4089_p11 = pnand %p4088_p12, %p3846_p3 }
 0xc9b   : > { %p4090_p9 = pneg %p4089_p11 }
 0xc9d   : > { %p4095_p7 = pnand %p4093_p2, %p4090_p9 }
 0xc9f   : > { %4098 = shalt.err (!%p4095_p7)
}
 0xca0   : > { %s4177_s17 = smov 128  }
 0xca1   : > { %3832 = dma.vmem_to_hbm [thread:$0]  (%p3846_p3), %s3336_s14, 256, %s5133_s0, [#allocation4], %s4177_s17, %s4177_s17, %s4174_s30  }
 0xca2   : > { %4132 = dma.done.wait (%p3846_p3), [#allocation4], 256  }
 0xca3   : > { %4134 = vsyncadd (%p3846_p3), [#allocation4], 4294967040 }
 0xca4 PF: > { %s5134_s24 = sld [smem:[#allocation13_spill]]  ;;  %s5135_s4 = sld [smem:[#allocation15_spill]] }
 0xca5   : > { %s5137_s25 = sld [smem:[#allocation14_spill]]  ;;  %s5138_s21 = smov %s4141_s22 }
 0xca6   : > { %s5139_s22 = smov %s4145_s23 }
 0xcaa   : > { %s33_s26 = sadd.s32 1, %s5134_s24   ;;  %s5136_s24 = sld [smem:[#allocation12_spill]] }
 0xcab   : > { %p30_p10 = scmp.ge.s32.totalorder %s33_s26, 4   ;;  %s5140_s23 = smov %s5135_s4 }
 0xcad   :  { %32 = sbr.rel (!%p30_p10) target bundleno = 18 (0x12), region = 191 }
 0xcb4   :  { %3351 = vsyncpa [#allocation3], 1 }
 0xcb5   :  { %3353 = vsyncpa [#allocation3 + $0x1], 1 }
 0xcb6   :  { %3354 = vsyncpa [#allocation6], 1 }
 0xcb7   :  { %3356 = vsyncpa [#allocation6 + $0x1], 1 }
 0xcb8   :  { %3357 = vsyncpa [#allocation4], 1 }
 0xcb9   :  { %3359 = vsyncpa [#allocation4 + $0x1], 1 }

</bundles_post_ra>
